<compile_context>
chip_gen: v6e
topology: v6e:2x2x1
jax: 0.10.0
libtpu: 0.0.40
codegen_flags: <defaults>
</compile_context>

<pallas_src>
import jax
import jax.numpy as jnp
from jax.experimental import pallas as pl
from jax.experimental.pallas import tpu as pltpu

LANES = 128  # f32 lane width of a vreg


def net2_kernel(scal_ref, x_ref, o_ref):
    # scal_ref: SMEM (2,) f32 -> [out0, out1]
    out0 = scal_ref[0]
    out1 = scal_ref[1]
    # HardDecision + both Linears + Tanh collapse to a two-way select.
    o_ref[...] = jnp.where(x_ref[...] > 0, out1, out0)


def _two_outputs(w1, b1, w2, b2):
    """The only two values the network can produce (h in {0, 1})."""
    out1 = (jnp.tanh(w1 + b1) @ w2 + b2).reshape(()).astype(jnp.float32)  # x > 0
    out0 = (jnp.tanh(b1) @ w2 + b2).reshape(()).astype(jnp.float32)       # x <= 0
    return out0, out1


def _batch_axis_semantics():
    """CORE_PARALLEL only on multi-TensorCore chips (v7x); 'parallel' elsewhere.

    'parallel' vs 'arbitrary' is a no-op on single-TC chips; CORE_PARALLEL is
    what actually splits the stream across v7x's two cores.
    """
    try:
        kind = jax.devices()[0].device_kind.lower()
    except Exception:
        kind = ""
    if "v7" in kind and hasattr(pltpu, "CORE_PARALLEL"):
        return (pltpu.CORE_PARALLEL,)
    return ("parallel",)


def _run_kernel(x2, scalars, tile_rows):
    """x2: [rows, 128] f32 (lane-dense). Returns [rows, 128] f32."""
    rows = x2.shape[0]
    tr = min(int(tile_rows), rows)
    tr = max(8, (tr // 8) * 8)                      # sublane multiple of 8
    grid = ((rows + tr - 1) // tr,)                 # ragged last block is OK

    return pl.pallas_call(
        net2_kernel,
        out_shape=jax.ShapeDtypeStruct((rows, LANES), jnp.float32),
        grid_spec=pltpu.PrefetchScalarGridSpec(
            num_scalar_prefetch=1,                  # scalars -> SMEM ref
            grid=grid,
            in_specs=[pl.BlockSpec((tr, LANES), lambda i, s: (i, 0))],
            out_specs=pl.BlockSpec((tr, LANES), lambda i, s: (i, 0)),
        ),
        compiler_params=pltpu.CompilerParams(
            dimension_semantics=_batch_axis_semantics(),
            # tr=2048 -> 4 MiB total double-buffered (in+out): well under the
            # scoped-VMEM default on v5e (16 MiB) and v6e/v7x (32 MiB), so no
            # vmem_limit_bytes override is needed.
        ),
    )(scalars, x2)


def net2_forward(x, w1, b1, w2, b2, *, tile_rows=2048, min_kernel_elems=256 * 1024):
    """x: [B, 1] f32; w1: [1, 10]; b1: [1, 10]; w2: [10, 1]; b2: [1, 1]."""
    B = x.shape[0]
    n = B  # total elements (feature dim is 1)

    out0, out1 = _two_outputs(w1, b1, w2, b2)

    # Small-batch fallback: the plain XLA select fuses with neighbours and
    # avoids pallas_call launch + wrapper-op overhead entirely.
    if n < min_kernel_elems:
        return jnp.where(x > 0, out1, out0).astype(jnp.float32)

    scalars = jnp.stack([out0, out1])               # (2,) f32 -> SMEM

    xf = x.reshape(n)                               # [B,1] -> [B]: pure reshape
    n_main = (n // LANES) * LANES                   # 128-aligned prefix
    rows = n_main // LANES

    if n_main == n:
        # Fast path: zero-copy reshape in, zero-copy reshape out.
        x2 = xf.reshape(rows, LANES)
        out2 = _run_kernel(x2, scalars, tile_rows)
        return out2.reshape(B, 1)

    # Non-128-aligned batch: kernel on the aligned prefix, plain select on the
    # <=127-element lane tail (no full-array pad / slice passes).
    x2 = xf[:n_main].reshape(rows, LANES)
    out_main = _run_kernel(x2, scalars, tile_rows).reshape(n_main, 1)
    tail = jnp.where(xf[n_main:] > 0, out1, out0).reshape(n - n_main, 1)
    return jnp.concatenate([out_main, tail], axis=0)


def init_params(key):
    """Deterministic init mirroring nn.Linear(1,10) and nn.Linear(10,1) shapes.

    PyTorch stores weight as [out, in]; we store the transpose [in, out] so the
    math reads x @ W directly. Biases kept as [1, out] rows for broadcasting.
    """
    k1, k2, k3, k4 = jax.random.split(key, 4)
    bound1 = 1.0  # 1/sqrt(in_features=1)
    w1 = jax.random.uniform(k1, (1, 10), jnp.float32, -bound1, bound1)
    b1 = jax.random.uniform(k2, (1, 10), jnp.float32, -bound1, bound1)
    bound2 = 1.0 / jnp.sqrt(10.0)
    w2 = jax.random.uniform(k3, (10, 1), jnp.float32, -bound2, bound2)
    b2 = jax.random.uniform(k4, (1, 1), jnp.float32, -bound2, bound2)
    return w1, b1, w2, b2


if __name__ == "__main__":
    key = jax.random.PRNGKey(0)
    kx, kp = jax.random.split(key)

    w1, b1, w2, b2 = init_params(kp)

    def ref_forward(xx):
        h = (xx > 0).astype(jnp.float32)
        return jnp.tanh(h @ w1 + b1) @ w2 + b2

    # 1) Tiny batch (module-scale shape) -> small-batch fallback path.
    x_small = jax.random.normal(kx, (8, 1), jnp.float32)
    out_small = jax.block_until_ready(net2_forward(x_small, w1, b1, w2, b2))
    assert out_small.shape == (8, 1)
    assert jnp.allclose(out_small, ref_forward(x_small), atol=1e-5), "small-batch mismatch"

    # 2) Large, 128-aligned batch -> zero-copy Pallas kernel path,
    #    2 grid tiles of 2048 rows each.
    B_big = 2 * 2048 * LANES  # 524288 elements -> rows = 4096
    x_big = jax.random.normal(jax.random.PRNGKey(1), (B_big, 1), jnp.float32)
    out_big = jax.block_until_ready(net2_forward(x_big, w1, b1, w2, b2))
    assert out_big.shape == (B_big, 1)
    assert jnp.allclose(out_big, ref_forward(x_big), atol=1e-5), "aligned-batch mismatch"

    # 3) Large, non-aligned batch -> kernel on aligned prefix (with a ragged
    #    last row-block in the grid) + XLA select on the lane tail.
    B_odd = 300_000 + 37
    x_odd = jax.random.normal(jax.random.PRNGKey(2), (B_odd, 1), jnp.float32)
    out_odd = jax.block_until_ready(net2_forward(x_odd, w1, b1, w2, b2))
    assert out_odd.shape == (B_odd, 1)
    assert jnp.allclose(out_odd, ref_forward(x_odd), atol=1e-5), "odd-batch mismatch"

    print("KERNEL_OK")
</pallas_src>

<mosaic_0001>
module attributes {stable_mosaic.version = 11 : i64} {
  func.func @net2_kernel(%arg0: i32, %arg1: memref<2xf32, #tpu.memory_space<smem>>, %arg2: memref<2048x128xf32, #tpu.memory_space<vmem>>, %arg3: memref<2048x128xf32, #tpu.memory_space<vmem>>) attributes {dimension_semantics = [#tpu.dimension_semantics<parallel>], iteration_bounds = array<i64: 2>, scalar_prefetch = 1 : i64, scratch_operands = 0 : i64, tpu.core_type = #tpu.core_type<tc>, window_params = [{transform_indices = @transform_0, window_bounds = array<i64: 2048, 128>}, {transform_indices = @transform_1, window_bounds = array<i64: 2048, 128>}]} {
    %c0 = arith.constant 0 : index
    %0 = memref.load %arg1[%c0] : memref<2xf32, #tpu.memory_space<smem>>
    %c1 = arith.constant 1 : index
    %1 = memref.load %arg1[%c1] : memref<2xf32, #tpu.memory_space<smem>>
    %c0_0 = arith.constant 0 : index
    %c0_1 = arith.constant 0 : index
    %2 = vector.load %arg2[%c0_0, %c0_1] : memref<2048x128xf32, #tpu.memory_space<vmem>>, vector<2048x128xf32>
    %cst = arith.constant 0.000000e+00 : f32
    %3 = vector.broadcast %cst : f32 to vector<2048x128xf32>
    %4 = arith.cmpf ogt, %2, %3 : vector<2048x128xf32>
    %5 = vector.broadcast %1 : f32 to vector<2048x128xf32>
    %6 = vector.broadcast %0 : f32 to vector<2048x128xf32>
    %7 = arith.select %4, %5, %6 : vector<2048x128xi1>, vector<2048x128xf32>
    %c0_2 = arith.constant 0 : index
    %c0_3 = arith.constant 0 : index
    %8 = vector.load %arg3[%c0_2, %c0_3] : memref<2048x128xf32, #tpu.memory_space<vmem>>, vector<2048x128xf32>
    tpu.vector_store %arg3[%c0_2, %c0_3], %7 {strides = array<i32>} : memref<2048x128xf32, #tpu.memory_space<vmem>>, vector<2048x128xf32>,
    return
  }
  func.func @transform_0(%arg0: i32, %arg1: memref<2xf32, #tpu.memory_space<smem>>) -> (i32, i32) {
    %c0_i32 = arith.constant 0 : i32
    %c0_i32_0 = arith.constant 0 : i32
    return %arg0, %c0_i32 : i32, i32
  }
  func.func @transform_1(%arg0: i32, %arg1: memref<2xf32, #tpu.memory_space<smem>>) -> (i32, i32) {
    %c0_i32 = arith.constant 0 : i32
    %c0_i32_0 = arith.constant 0 : i32
    return %arg0, %c0_i32 : i32, i32
  }
}

</mosaic_0001>

<bundles_post_ra>
// kernel: tpu_custom_call.1
= control target key start
LH: loop header
LB: loop body
LE: loop exit
PB: predicated region body
PF: predicated region fallthrough
CT: control target
= control target key end

     0   :  { %s1429_s9 = smov [#allocation3]   ;;  %s2641_s0 = inlined_call_operand.hbm [shape: f32[2], index: 0, kind: input, shape index: {}]   ;;  %s2642_s1 = inlined_call_operand.hbm [shape: f32[4096,128], index: 1, kind: input, shape index: {}]   ;;  %s2643_s2 = inlined_call_operand.hbm [shape: f32[4096,128], index: 2, kind: output, shape index: {}]  }
   0x1   :  { %8 = dma.hbm_to_smem %s2641_s0, 16, %s1429_s9, [#allocation2] }
   0x2   :  { %1403 = dma.done.wait [#allocation2], 16 }
   0x3   :  { %1404 = vsyncadd [#allocation2], 4294967280 }
   0x4   :  { %10 = sfence }
   0x5   :  { %11 = vsyncpa [#allocation5], 0 }
   0x6   :  { %13 = vsyncpa [#allocation5 + $0x1], 0 }
   0x7   :  { %14 = vsyncpa [#allocation6], 0 }
   0x8   :  { %16 = vsyncpa [#allocation6 + $0x1], 0  ;;  %s1454_s12 = smov 0   ;;  %s1456_s13 = smov 0  }
   0x9   :  { %s1458_s14 = smov 0   ;;  %s1460_s15 = smov 0  }
   0xa LB: > { %s1475_s0 = sadd.s32 4294967295, %s1427_s15   ;;  %s1257_s16 = sadd.s32 4294967294, %s1427_s15   ;;  %s1427_s15 = sphi %s1460_s15, %s2658_s15   ;;  %s1423_s14 = sphi %s1458_s14, %s2657_s14   ;;  %s1419_s13 = sphi %s1456_s13, %s2656_s13   ;;  %s1415_s12 = sphi %s1454_s12, %s2655_s12  }
   0xb   : > { %s1479_s17 = sadd.s32 1, %s1427_s15   ;;  %s29_s18 = sadd.s32 1, %s1423_s14 }
   0xc   : > { %s26_s19 = ssub.s32 %s1427_s15, %s1479_s17  ;;  %p36_p0 = scmp.ne.s32.totalorder %s1423_s14, %s1419_s13 }
   0xd   : > { %p27_p1 = scmp.eq.s32.totalorder %s26_s19, 0  ;;  %p37_p2 = scmp.eq.s32.totalorder %s1427_s15, 0 }
   0xe   : > { %p42_p3 = scmp.ne.s32.totalorder %s1419_s13, %s1415_s12  ;;  %p43_p4 = scmp.eq.s32.totalorder %s1475_s0, 0 }
   0xf   : > { %s1491_s20 = scalar_select %p27_p1, %s1423_s14, %s29_s18  }
  0x10   : > { %p1493_p5 = por %p37_p2, %p36_p0  ;;  %p1497_p6 = por %p43_p4, %p42_p3 }
  0x11   : > { %p66_p7 = scmp.eq.s32.totalorder %s1475_s0, 1  ;;  %p72_p8 = scmp.eq.s32.totalorder %s1257_s16, 1 }
  0x12   : > { %s2647_s22 = scalar_select %p1497_p6, 1, 0 }
  0x13   : > { %p1286_p10 = scmp.lt.s32.totalorder %s1427_s15, 2  ;;  %p1504_p11 = por %p66_p7, %p36_p0 }
  0x14   : > { %p1508_p12 = por %p72_p8, %p42_p3  ;;  %s92_s25 = sand.u32 1, %s1423_s14  }
  0x15   : > { %s2648_s23 = scalar_select %p1504_p11, 1, 0 }
  0x16   : > { %s2649_s24 = scalar_select %p1508_p12, 1, 0 }
  0x17   : > { %s1272_s26 = sshll.u32 %s1427_s15, 15  ;;  %s1260_s27 = sshll.u32 %s92_s25, 11 }
  0x18   : > { %s1517_s30 = scalar_lea.hbm %s2642_s1, %s1272_s26  ;;  %s96_s3 = scalar_lea.vmem [#allocation4], %s1260_s27 }
  0x19   : > { %s103_s4 = sshll.u32 %s96_s3, 4  ;;  %p1521_p13 = pnand %p1286_p10, %p1493_p5  ;;  %s1525_s4 = int_to_ptr.vmem [resolvable:$true] %s103_s4 }
  0x1a   : > { %s1527_s6 = scalar_lea.sflag [#allocation5], %s92_s25  ;;  %s1333_s7 = scalar_lea.hbm %s1517_s30, 32768 }
  0x1b   : > { %p1334_p0 = scmp.ne.s32.totalorder %s1517_s30, %s1333_s7  ;;  %p1335_p1 = pneg %p1521_p13 }
  0x1c   : > { %s1338_s10 = scalar_lea.hbm %s2642_s1, 65536  ;;  %p1339_p4 = scmp.lt.s32.totalorder %s1517_s30, %s2642_s1 }
  0x1d   : > { %p1336_p2 = pnand %p1335_p1, %p1334_p0  ;;  %p1340_p5 = scmp.lt.s32.totalorder %s1338_s10, %s1333_s7 }
  0x1f   : > { %p1337_p3 = pneg %p1336_p2  ;;  %p1341_p7 = por %p1340_p5, %p1339_p4 }
  0x21   : > { %p1342_p8 = pnand %p1341_p7, %p1337_p3 }
  0x23   : > { %1345 = shalt.err (!%p1342_p8)
}
  0x24   : > { %s1346_s18 = scalar_lea.vmem %s1525_s4, 32768  ;;  %s1430_s19 = smov [#allocation4]  }
  0x25   : > { %p1347_p10 = scmp.ne.s32.totalorder %s1525_s4, %s1346_s18  ;;  %s1351_s21 = sshll.u32 %s1430_s19, 4  ;;  %s1352_s21 = int_to_ptr.vmem [resolvable:$false] %s1351_s21 }
  0x26   : > { %s1353_s25 = scalar_lea.vmem %s1352_s21, 65536  ;;  %p1354_p2 = scmp.lt.s32.totalorder %s1525_s4, %s1352_s21 }
  0x27   : > { %p1349_p9 = pnand %p1347_p10, %p1335_p1  ;;  %p1355_p12 = scmp.lt.s32.totalorder %s1353_s25, %s1346_s18 }
  0x29   : > { %p1350_p0 = pneg %p1349_p9  ;;  %p1356_p11 = por %p1355_p12, %p1354_p2 }
  0x2b   : > { %p1357_p6 = pnand %p1356_p11, %p1350_p0 }
  0x2d   : > { %1360 = shalt.err (!%p1357_p6)
}
  0x2e   : > { %s1431_s26 = smov 128   ;;  %s1432_s27 = smov 8  }
  0x2f   : > { %1281 = dma.hbm_to_vmem [thread:$0]  (!%p1521_p13), %s1517_s30, 32768, %s1525_s4, %s1527_s6, %s1431_s26, %s1431_s26, %s1432_s27  }
  0x30   : > { %p1263_p9 = scmp.ge.s32.totalorder %s1427_s15, 1  ;;  %p111_p1 = scmp.lt.s32.totalorder %s1427_s15, 3 }
  0x32   : > { %p112_p3 = pnand %p1263_p9, %p111_p1 }
  0x33   : > { %s1551_s28 = sand.u32 (!%p112_p3), 1, %s1419_s13   ;;  %p2651_p6 = scmp.ne.s32.totalorder (!%p112_p3), %s2647_s22, 0 }
  0x34   : > { %115 = sbr.rel (%p112_p3) target bundleno = 208 (0xd0), region = 24  ;;  %s1264_s29 = sshll.u32 (!%p112_p3), %s1551_s28, 11 }
  0x35   : > { %s118_s3 = scalar_lea.sflag (!%p112_p3), [#allocation5], %s1551_s28  ;;  %s1555_s7 = scalar_lea.vmem (!%p112_p3), [#allocation4], %s1264_s29 }
  0x39   : > { %1406 = dma.done.wait (%p2651_p6), %s118_s3, 32768  }
  0x3a   : > { %1408 = vsyncadd (%p2651_p6), %s118_s3, 4294934528  ;;  %s142_s30 = sld [smem:[#allocation3]]  ;;  %v144_v0 = vld [vmem:[%s1555_s7] sm:$0xff]  ;;  %v145_v2 = vld [vmem:[%s1555_s7 + $0x8] sm:$0xff]  ;;  %s1580_s22 = scalar_lea.vmem [#allocation7], %s1264_s29 }
  0x3b   : > { %s1266_s4 = sld [smem:[#allocation3 + $0x1]]  ;;  %v146_v3 = vld [vmem:[%s1555_s7 + $0x10] sm:$0xff]  ;;  %vm400_vm0 = vcmp.gt.f32.partialorder %v144_v0, 0.0  ;;  %vm401_vm1 = vcmp.gt.f32.partialorder %v145_v2, 0.0  ;;  %v147_v5 = vld [vmem:[%s1555_s7 + $0x18] sm:$0xff]  ;;  %v148_v6 = vld [vmem:[%s1555_s7 + $0x20] sm:$0xff] }
  0x3c   : > { %vm402_vm2 = vcmp.gt.f32.partialorder %v146_v3, 0.0  ;;  %v149_v7 = vld [vmem:[%s1555_s7 + $0x28] sm:$0xff]  ;;  %vm403_vm3 = vcmp.gt.f32.partialorder %v147_v5, 0.0  ;;  %v150_v11 = vld [vmem:[%s1555_s7 + $0x30] sm:$0xff]  ;;  %v151_v12 = vld [vmem:[%s1555_s7 + $0x38] sm:$0xff]  ;;  %vm404_vm4 = vcmp.gt.f32.partialorder %v148_v6, 0.0 }
  0x3d   : > { %v152_v13 = vld [vmem:[%s1555_s7 + $0x40] sm:$0xff]  ;;  %vm405_vm5 = vcmp.gt.f32.partialorder %v149_v7, 0.0  ;;  %vm406_vm6 = vcmp.gt.f32.partialorder %v150_v11, 0.0  ;;  %v153_v15 = vld [vmem:[%s1555_s7 + $0x48] sm:$0xff]  ;;  %v154_v16 = vld [vmem:[%s1555_s7 + $0x50] sm:$0xff]  ;;  %vm407_vm7 = vcmp.gt.f32.partialorder %v151_v12, 0.0 }
  0x3e   : > { %v155_v17 = vld [vmem:[%s1555_s7 + $0x58] sm:$0xff]  ;;  %v156_v21 = vld [vmem:[%s1555_s7 + $0x60] sm:$0xff]  ;;  %v157_v22 = vld [vmem:[%s1555_s7 + $0x68] sm:$0xff]  ;;  %vm408_vm8 = vcmp.gt.f32.partialorder %v152_v13, 0.0  ;;  %vm409_vm9 = vcmp.gt.f32.partialorder %v153_v15, 0.0  ;;  %vm410_vm10 = vcmp.gt.f32.partialorder %v154_v16, 0.0 }
  0x3f   : > { %v158_v23 = vld [vmem:[%s1555_s7 + $0x70] sm:$0xff]  ;;  %v159_v25 = vld [vmem:[%s1555_s7 + $0x78] sm:$0xff]  ;;  %vm411_vm11 = vcmp.gt.f32.partialorder %v155_v17, 0.0  ;;  %v160_v29 = vld [vmem:[%s1555_s7 + $0x80] sm:$0xff]  ;;  %vm412_vm12 = vcmp.gt.f32.partialorder %v156_v21, 0.0  ;;  %vm413_vm13 = vcmp.gt.f32.partialorder %v157_v22, 0.0 }
  0x40   : > { %v1562_v1 = vstv %s142_s30  ;;  %v161_v30 = vld [vmem:[%s1555_s7 + $0x88] sm:$0xff]  ;;  %v162_v31 = vld [vmem:[%s1555_s7 + $0x90] sm:$0xff]  ;;  %vm414_vm14 = vcmp.gt.f32.partialorder %v158_v23, 0.0  ;;  %v163_v33 = vld [vmem:[%s1555_s7 + $0x98] sm:$0xff]  ;;  %vm415_vm15 = vcmp.gt.f32.partialorder %v159_v25, 0.0  ;;  %s1273_s5 = sshll.u32 %s1475_s0, 15 }
  0x41   : > { %v1566_v4 = vstv %s1266_s4  ;;  %v164_v37 = vld [vmem:[%s1555_s7 + $0xa0] sm:$0xff]  ;;  %v165_v38 = vld [vmem:[%s1555_s7 + $0xa8] sm:$0xff]  ;;  %v166_v39 = vld [vmem:[%s1555_s7 + $0xb0] sm:$0xff]  ;;  %s1184_s6 = sshll.u32 %s1580_s22, 4  ;;  %s2583_s9 = scalar_lea.hbm %s2643_s2, %s1273_s5  ;;  %s2592_s6 = int_to_ptr.vmem [resolvable:$true] %s1184_s6 }
  0x42   : > { %v658_v8 = vsel %vm400_vm0, %v1566_v4, %v1562_v1  ;;  %v659_v9 = vsel %vm401_vm1, %v1566_v4, %v1562_v1  ;;  %v660_v10 = vsel %vm402_vm2, %v1566_v4, %v1562_v1  ;;  %v661_v14 = vsel %vm403_vm3, %v1566_v4, %v1562_v1  ;;  %v167_v41 = vld [vmem:[%s1555_s7 + $0xb8] sm:$0xff]  ;;  %v168_v45 = vld [vmem:[%s1555_s7 + $0xc0] sm:$0xff]  ;;  %v169_v46 = vld [vmem:[%s1555_s7 + $0xc8] sm:$0xff]  ;;  %s1171_s10 = scalar_lea.sflag [#allocation6], %s1551_s28  ;;  %s1361_s11 = scalar_lea.vmem %s2592_s6, 32768 }
  0x43   : > { %914 = vst [vmem:[%s1580_s22] sm:$0xff] %v658_v8  ;;  %915 = vst [vmem:[%s1580_s22 + $0x8] sm:$0xff] %v659_v9  ;;  %v662_v18 = vsel %vm404_vm4, %v1566_v4, %v1562_v1  ;;  %v663_v19 = vsel %vm405_vm5, %v1566_v4, %v1562_v1  ;;  %v664_v20 = vsel %vm406_vm6, %v1566_v4, %v1562_v1  ;;  %vm416_vm0 = vcmp.gt.f32.partialorder %v160_v29, 0.0  ;;  %v170_v47 = vld [vmem:[%s1555_s7 + $0xd0] sm:$0xff]  ;;  %v171_v49 = vld [vmem:[%s1555_s7 + $0xd8] sm:$0xff]  ;;  %p1362_p11 = scmp.ne.s32.totalorder %s2592_s6, %s1361_s11  ;;  %p2652_p12 = scmp.ne.s32.totalorder %s2648_s23, 0 }
  0x44   : > { %916 = vst [vmem:[%s1580_s22 + $0x10] sm:$0xff] %v660_v10  ;;  %917 = vst [vmem:[%s1580_s22 + $0x18] sm:$0xff] %v661_v14  ;;  %v665_v24 = vsel %vm407_vm7, %v1566_v4, %v1562_v1  ;;  %v666_v26 = vsel %vm408_vm8, %v1566_v4, %v1562_v1  ;;  %v667_v27 = vsel %vm409_vm9, %v1566_v4, %v1562_v1  ;;  %vm417_vm1 = vcmp.gt.f32.partialorder %v161_v30, 0.0  ;;  %v172_v53 = vld [vmem:[%s1555_s7 + $0xe0] sm:$0xff]  ;;  %v173_v54 = vld [vmem:[%s1555_s7 + $0xe8] sm:$0xff]  ;;  %s1433_s16 = smov [#allocation7]  }
  0x45   : > { %918 = vst [vmem:[%s1580_s22 + $0x20] sm:$0xff] %v662_v18  ;;  %919 = vst [vmem:[%s1580_s22 + $0x28] sm:$0xff] %v663_v19  ;;  %v668_v28 = vsel %vm410_vm10, %v1566_v4, %v1562_v1  ;;  %v669_v32 = vsel %vm411_vm11, %v1566_v4, %v1562_v1  ;;  %v670_v34 = vsel %vm412_vm12, %v1566_v4, %v1562_v1  ;;  %vm418_vm2 = vcmp.gt.f32.partialorder %v162_v31, 0.0  ;;  %v174_v55 = vld [vmem:[%s1555_s7 + $0xf0] sm:$0xff]  ;;  %v175_v57 = vld [vmem:[%s1555_s7 + $0xf8] sm:$0xff]  ;;  %p1363_p13 = pnand %p1362_p11, %p2652_p12  ;;  %s1365_s18 = sshll.u32 %s1433_s16, 4  ;;  %s1366_s18 = int_to_ptr.vmem [resolvable:$false] %s1365_s18 }
  0x46   : > { %920 = vst [vmem:[%s1580_s22 + $0x30] sm:$0xff] %v664_v20  ;;  %921 = vst [vmem:[%s1580_s22 + $0x38] sm:$0xff] %v665_v24  ;;  %v671_v35 = vsel %vm413_vm13, %v1566_v4, %v1562_v1  ;;  %v672_v36 = vsel %vm414_vm14, %v1566_v4, %v1562_v1  ;;  %v673_v40 = vsel %vm415_vm15, %v1566_v4, %v1562_v1  ;;  %vm419_vm3 = vcmp.gt.f32.partialorder %v163_v33, 0.0  ;;  %v176_v61 = vld [vmem:[%s1555_s7 + $0x100] sm:$0xff]  ;;  %v177_v62 = vld [vmem:[%s1555_s7 + $0x108] sm:$0xff]  ;;  %s1367_s19 = scalar_lea.vmem %s1366_s18, 65536  ;;  %p1368_p5 = scmp.lt.s32.totalorder %s2592_s6, %s1366_s18 }
  0x47   : > { %922 = vst [vmem:[%s1580_s22 + $0x40] sm:$0xff] %v666_v26  ;;  %923 = vst [vmem:[%s1580_s22 + $0x48] sm:$0xff] %v667_v27  ;;  %v674_v42 = vsel %vm416_vm0, %v1566_v4, %v1562_v1  ;;  %v675_v43 = vsel %vm417_vm1, %v1566_v4, %v1562_v1  ;;  %v676_v44 = vsel %vm418_vm2, %v1566_v4, %v1562_v1  ;;  %vm420_vm4 = vcmp.gt.f32.partialorder %v164_v37, 0.0  ;;  %v178_v63 = vld [vmem:[%s1555_s7 + $0x110] sm:$0xff]  ;;  %v179_v2 = vld [vmem:[%s1555_s7 + $0x118] sm:$0xff]  ;;  %p1364_p4 = pneg %p1363_p13  ;;  %p1369_p7 = scmp.lt.s32.totalorder %s1367_s19, %s1361_s11 }
  0x48   : > { %924 = vst [vmem:[%s1580_s22 + $0x50] sm:$0xff] %v668_v28  ;;  %925 = vst [vmem:[%s1580_s22 + $0x58] sm:$0xff] %v669_v32  ;;  %v677_v48 = vsel %vm419_vm3, %v1566_v4, %v1562_v1  ;;  %vm421_vm5 = vcmp.gt.f32.partialorder %v165_v38, 0.0  ;;  %vm422_vm6 = vcmp.gt.f32.partialorder %v166_v39, 0.0  ;;  %v678_v50 = vsel %vm420_vm4, %v1566_v4, %v1562_v1  ;;  %v180_v7 = vld [vmem:[%s1555_s7 + $0x120] sm:$0xff]  ;;  %v181_v8 = vld [vmem:[%s1555_s7 + $0x128] sm:$0xff] }
  0x49   : > { %926 = vst [vmem:[%s1580_s22 + $0x60] sm:$0xff] %v670_v34  ;;  %927 = vst [vmem:[%s1580_s22 + $0x68] sm:$0xff] %v671_v35  ;;  %v679_v51 = vsel %vm421_vm5, %v1566_v4, %v1562_v1  ;;  %v680_v52 = vsel %vm422_vm6, %v1566_v4, %v1562_v1  ;;  %vm423_vm7 = vcmp.gt.f32.partialorder %v167_v41, 0.0  ;;  %vm424_vm8 = vcmp.gt.f32.partialorder %v168_v45, 0.0  ;;  %v182_v9 = vld [vmem:[%s1555_s7 + $0x130] sm:$0xff]  ;;  %v183_v11 = vld [vmem:[%s1555_s7 + $0x138] sm:$0xff]  ;;  %p1370_p8 = por %p1369_p7, %p1368_p5 }
  0x4a   : > { %928 = vst [vmem:[%s1580_s22 + $0x70] sm:$0xff] %v672_v36  ;;  %929 = vst [vmem:[%s1580_s22 + $0x78] sm:$0xff] %v673_v40  ;;  %v681_v56 = vsel %vm423_vm7, %v1566_v4, %v1562_v1  ;;  %vm425_vm9 = vcmp.gt.f32.partialorder %v169_v46, 0.0  ;;  %vm426_vm10 = vcmp.gt.f32.partialorder %v170_v47, 0.0  ;;  %v682_v58 = vsel %vm424_vm8, %v1566_v4, %v1562_v1  ;;  %v184_v15 = vld [vmem:[%s1555_s7 + $0x140] sm:$0xff]  ;;  %v185_v16 = vld [vmem:[%s1555_s7 + $0x148] sm:$0xff] }
  0x4b   : > { %930 = vst [vmem:[%s1580_s22 + $0x80] sm:$0xff] %v674_v42  ;;  %931 = vst [vmem:[%s1580_s22 + $0x88] sm:$0xff] %v675_v43  ;;  %v683_v59 = vsel %vm425_vm9, %v1566_v4, %v1562_v1  ;;  %v684_v60 = vsel %vm426_vm10, %v1566_v4, %v1562_v1  ;;  %vm427_vm11 = vcmp.gt.f32.partialorder %v171_v49, 0.0  ;;  %vm428_vm12 = vcmp.gt.f32.partialorder %v172_v53, 0.0  ;;  %v186_v17 = vld [vmem:[%s1555_s7 + $0x150] sm:$0xff]  ;;  %v187_v19 = vld [vmem:[%s1555_s7 + $0x158] sm:$0xff]  ;;  %p1371_p10 = pnand %p1370_p8, %p1364_p4 }
  0x4c   : > { %932 = vst [vmem:[%s1580_s22 + $0x90] sm:$0xff] %v676_v44  ;;  %933 = vst [vmem:[%s1580_s22 + $0x98] sm:$0xff] %v677_v48  ;;  %v685_v0 = vsel %vm427_vm11, %v1566_v4, %v1562_v1  ;;  %vm429_vm13 = vcmp.gt.f32.partialorder %v173_v54, 0.0  ;;  %vm430_vm14 = vcmp.gt.f32.partialorder %v174_v55, 0.0  ;;  %v686_v3 = vsel %vm428_vm12, %v1566_v4, %v1562_v1  ;;  %v188_v23 = vld [vmem:[%s1555_s7 + $0x160] sm:$0xff]  ;;  %v189_v24 = vld [vmem:[%s1555_s7 + $0x168] sm:$0xff] }
  0x4d   : > { %934 = vst [vmem:[%s1580_s22 + $0xa0] sm:$0xff] %v678_v50  ;;  %935 = vst [vmem:[%s1580_s22 + $0xa8] sm:$0xff] %v679_v51  ;;  %v687_v5 = vsel %vm429_vm13, %v1566_v4, %v1562_v1  ;;  %v688_v6 = vsel %vm430_vm14, %v1566_v4, %v1562_v1  ;;  %vm431_vm15 = vcmp.gt.f32.partialorder %v175_v57, 0.0  ;;  %vm432_vm0 = vcmp.gt.f32.partialorder %v176_v61, 0.0  ;;  %v190_v25 = vld [vmem:[%s1555_s7 + $0x170] sm:$0xff]  ;;  %v191_v27 = vld [vmem:[%s1555_s7 + $0x178] sm:$0xff] }
  0x4e   : > { %936 = vst [vmem:[%s1580_s22 + $0xb0] sm:$0xff] %v680_v52  ;;  %937 = vst [vmem:[%s1580_s22 + $0xb8] sm:$0xff] %v681_v56  ;;  %v689_v10 = vsel %vm431_vm15, %v1566_v4, %v1562_v1  ;;  %vm433_vm1 = vcmp.gt.f32.partialorder %v177_v62, 0.0  ;;  %vm434_vm2 = vcmp.gt.f32.partialorder %v178_v63, 0.0  ;;  %v690_v12 = vsel %vm432_vm0, %v1566_v4, %v1562_v1  ;;  %v192_v31 = vld [vmem:[%s1555_s7 + $0x180] sm:$0xff]  ;;  %v193_v32 = vld [vmem:[%s1555_s7 + $0x188] sm:$0xff] }
  0x4f   : > { %938 = vst [vmem:[%s1580_s22 + $0xc0] sm:$0xff] %v682_v58  ;;  %939 = vst [vmem:[%s1580_s22 + $0xc8] sm:$0xff] %v683_v59  ;;  %v691_v13 = vsel %vm433_vm1, %v1566_v4, %v1562_v1  ;;  %v692_v14 = vsel %vm434_vm2, %v1566_v4, %v1562_v1  ;;  %vm435_vm3 = vcmp.gt.f32.partialorder %v179_v2, 0.0  ;;  %vm436_vm4 = vcmp.gt.f32.partialorder %v180_v7, 0.0  ;;  %v194_v33 = vld [vmem:[%s1555_s7 + $0x190] sm:$0xff]  ;;  %v195_v35 = vld [vmem:[%s1555_s7 + $0x198] sm:$0xff] }
  0x50   : > { %940 = vst [vmem:[%s1580_s22 + $0xd0] sm:$0xff] %v684_v60  ;;  %941 = vst [vmem:[%s1580_s22 + $0xd8] sm:$0xff] %v685_v0  ;;  %v693_v18 = vsel %vm435_vm3, %v1566_v4, %v1562_v1  ;;  %vm437_vm5 = vcmp.gt.f32.partialorder %v181_v8, 0.0  ;;  %vm438_vm6 = vcmp.gt.f32.partialorder %v182_v9, 0.0  ;;  %v694_v20 = vsel %vm436_vm4, %v1566_v4, %v1562_v1  ;;  %v196_v39 = vld [vmem:[%s1555_s7 + $0x1a0] sm:$0xff]  ;;  %v197_v40 = vld [vmem:[%s1555_s7 + $0x1a8] sm:$0xff] }
  0x51   : > { %942 = vst [vmem:[%s1580_s22 + $0xe0] sm:$0xff] %v686_v3  ;;  %943 = vst [vmem:[%s1580_s22 + $0xe8] sm:$0xff] %v687_v5  ;;  %v695_v21 = vsel %vm437_vm5, %v1566_v4, %v1562_v1  ;;  %v696_v22 = vsel %vm438_vm6, %v1566_v4, %v1562_v1  ;;  %vm439_vm7 = vcmp.gt.f32.partialorder %v183_v11, 0.0  ;;  %vm440_vm8 = vcmp.gt.f32.partialorder %v184_v15, 0.0  ;;  %v198_v41 = vld [vmem:[%s1555_s7 + $0x1b0] sm:$0xff]  ;;  %v199_v43 = vld [vmem:[%s1555_s7 + $0x1b8] sm:$0xff] }
  0x52   : > { %944 = vst [vmem:[%s1580_s22 + $0xf0] sm:$0xff] %v688_v6  ;;  %945 = vst [vmem:[%s1580_s22 + $0xf8] sm:$0xff] %v689_v10  ;;  %v697_v26 = vsel %vm439_vm7, %v1566_v4, %v1562_v1  ;;  %vm441_vm9 = vcmp.gt.f32.partialorder %v185_v16, 0.0  ;;  %vm442_vm10 = vcmp.gt.f32.partialorder %v186_v17, 0.0  ;;  %v698_v28 = vsel %vm440_vm8, %v1566_v4, %v1562_v1  ;;  %v200_v47 = vld [vmem:[%s1555_s7 + $0x1c0] sm:$0xff]  ;;  %v201_v48 = vld [vmem:[%s1555_s7 + $0x1c8] sm:$0xff] }
  0x53   : > { %946 = vst [vmem:[%s1580_s22 + $0x100] sm:$0xff] %v690_v12  ;;  %947 = vst [vmem:[%s1580_s22 + $0x108] sm:$0xff] %v691_v13  ;;  %v699_v29 = vsel %vm441_vm9, %v1566_v4, %v1562_v1  ;;  %v700_v30 = vsel %vm442_vm10, %v1566_v4, %v1562_v1  ;;  %vm443_vm11 = vcmp.gt.f32.partialorder %v187_v19, 0.0  ;;  %vm444_vm12 = vcmp.gt.f32.partialorder %v188_v23, 0.0  ;;  %v202_v49 = vld [vmem:[%s1555_s7 + $0x1d0] sm:$0xff]  ;;  %v203_v51 = vld [vmem:[%s1555_s7 + $0x1d8] sm:$0xff] }
  0x54   : > { %948 = vst [vmem:[%s1580_s22 + $0x110] sm:$0xff] %v692_v14  ;;  %949 = vst [vmem:[%s1580_s22 + $0x118] sm:$0xff] %v693_v18  ;;  %v701_v34 = vsel %vm443_vm11, %v1566_v4, %v1562_v1  ;;  %vm445_vm13 = vcmp.gt.f32.partialorder %v189_v24, 0.0  ;;  %vm446_vm14 = vcmp.gt.f32.partialorder %v190_v25, 0.0  ;;  %v702_v36 = vsel %vm444_vm12, %v1566_v4, %v1562_v1  ;;  %v204_v55 = vld [vmem:[%s1555_s7 + $0x1e0] sm:$0xff]  ;;  %v205_v56 = vld [vmem:[%s1555_s7 + $0x1e8] sm:$0xff] }
  0x55   : > { %950 = vst [vmem:[%s1580_s22 + $0x120] sm:$0xff] %v694_v20  ;;  %951 = vst [vmem:[%s1580_s22 + $0x128] sm:$0xff] %v695_v21  ;;  %v703_v37 = vsel %vm445_vm13, %v1566_v4, %v1562_v1  ;;  %v704_v38 = vsel %vm446_vm14, %v1566_v4, %v1562_v1  ;;  %vm447_vm15 = vcmp.gt.f32.partialorder %v191_v27, 0.0  ;;  %vm448_vm0 = vcmp.gt.f32.partialorder %v192_v31, 0.0  ;;  %v206_v57 = vld [vmem:[%s1555_s7 + $0x1f0] sm:$0xff]  ;;  %v207_v59 = vld [vmem:[%s1555_s7 + $0x1f8] sm:$0xff] }
  0x56   : > { %952 = vst [vmem:[%s1580_s22 + $0x130] sm:$0xff] %v696_v22  ;;  %953 = vst [vmem:[%s1580_s22 + $0x138] sm:$0xff] %v697_v26  ;;  %v705_v42 = vsel %vm447_vm15, %v1566_v4, %v1562_v1  ;;  %vm449_vm1 = vcmp.gt.f32.partialorder %v193_v32, 0.0  ;;  %vm450_vm2 = vcmp.gt.f32.partialorder %v194_v33, 0.0  ;;  %v706_v44 = vsel %vm448_vm0, %v1566_v4, %v1562_v1  ;;  %v208_v63 = vld [vmem:[%s1555_s7 + $0x200] sm:$0xff]  ;;  %v209_v0 = vld [vmem:[%s1555_s7 + $0x208] sm:$0xff] }
  0x57   : > { %954 = vst [vmem:[%s1580_s22 + $0x140] sm:$0xff] %v698_v28  ;;  %955 = vst [vmem:[%s1580_s22 + $0x148] sm:$0xff] %v699_v29  ;;  %v707_v45 = vsel %vm449_vm1, %v1566_v4, %v1562_v1  ;;  %v708_v46 = vsel %vm450_vm2, %v1566_v4, %v1562_v1  ;;  %vm451_vm3 = vcmp.gt.f32.partialorder %v195_v35, 0.0  ;;  %vm452_vm4 = vcmp.gt.f32.partialorder %v196_v39, 0.0  ;;  %v210_v2 = vld [vmem:[%s1555_s7 + $0x210] sm:$0xff]  ;;  %v211_v5 = vld [vmem:[%s1555_s7 + $0x218] sm:$0xff] }
  0x58   : > { %956 = vst [vmem:[%s1580_s22 + $0x150] sm:$0xff] %v700_v30  ;;  %957 = vst [vmem:[%s1580_s22 + $0x158] sm:$0xff] %v701_v34  ;;  %v709_v50 = vsel %vm451_vm3, %v1566_v4, %v1562_v1  ;;  %vm453_vm5 = vcmp.gt.f32.partialorder %v197_v40, 0.0  ;;  %vm454_vm6 = vcmp.gt.f32.partialorder %v198_v41, 0.0  ;;  %v710_v52 = vsel %vm452_vm4, %v1566_v4, %v1562_v1  ;;  %v212_v9 = vld [vmem:[%s1555_s7 + $0x220] sm:$0xff]  ;;  %v213_v10 = vld [vmem:[%s1555_s7 + $0x228] sm:$0xff] }
  0x59   : > { %958 = vst [vmem:[%s1580_s22 + $0x160] sm:$0xff] %v702_v36  ;;  %959 = vst [vmem:[%s1580_s22 + $0x168] sm:$0xff] %v703_v37  ;;  %v711_v53 = vsel %vm453_vm5, %v1566_v4, %v1562_v1  ;;  %v712_v54 = vsel %vm454_vm6, %v1566_v4, %v1562_v1  ;;  %vm455_vm7 = vcmp.gt.f32.partialorder %v199_v43, 0.0  ;;  %vm456_vm8 = vcmp.gt.f32.partialorder %v200_v47, 0.0  ;;  %v214_v11 = vld [vmem:[%s1555_s7 + $0x230] sm:$0xff]  ;;  %v215_v13 = vld [vmem:[%s1555_s7 + $0x238] sm:$0xff] }
  0x5a   : > { %960 = vst [vmem:[%s1580_s22 + $0x170] sm:$0xff] %v704_v38  ;;  %961 = vst [vmem:[%s1580_s22 + $0x178] sm:$0xff] %v705_v42  ;;  %v713_v58 = vsel %vm455_vm7, %v1566_v4, %v1562_v1  ;;  %vm457_vm9 = vcmp.gt.f32.partialorder %v201_v48, 0.0  ;;  %vm458_vm10 = vcmp.gt.f32.partialorder %v202_v49, 0.0  ;;  %v714_v60 = vsel %vm456_vm8, %v1566_v4, %v1562_v1  ;;  %v216_v17 = vld [vmem:[%s1555_s7 + $0x240] sm:$0xff]  ;;  %v217_v18 = vld [vmem:[%s1555_s7 + $0x248] sm:$0xff] }
  0x5b   : > { %962 = vst [vmem:[%s1580_s22 + $0x180] sm:$0xff] %v706_v44  ;;  %963 = vst [vmem:[%s1580_s22 + $0x188] sm:$0xff] %v707_v45  ;;  %v715_v61 = vsel %vm457_vm9, %v1566_v4, %v1562_v1  ;;  %v716_v62 = vsel %vm458_vm10, %v1566_v4, %v1562_v1  ;;  %vm459_vm11 = vcmp.gt.f32.partialorder %v203_v51, 0.0  ;;  %vm460_vm12 = vcmp.gt.f32.partialorder %v204_v55, 0.0  ;;  %v218_v19 = vld [vmem:[%s1555_s7 + $0x250] sm:$0xff]  ;;  %v219_v21 = vld [vmem:[%s1555_s7 + $0x258] sm:$0xff] }
  0x5c   : > { %964 = vst [vmem:[%s1580_s22 + $0x190] sm:$0xff] %v708_v46  ;;  %965 = vst [vmem:[%s1580_s22 + $0x198] sm:$0xff] %v709_v50  ;;  %v717_v3 = vsel %vm459_vm11, %v1566_v4, %v1562_v1  ;;  %vm461_vm13 = vcmp.gt.f32.partialorder %v205_v56, 0.0  ;;  %vm462_vm14 = vcmp.gt.f32.partialorder %v206_v57, 0.0  ;;  %v718_v6 = vsel %vm460_vm12, %v1566_v4, %v1562_v1  ;;  %v220_v25 = vld [vmem:[%s1555_s7 + $0x260] sm:$0xff]  ;;  %v221_v26 = vld [vmem:[%s1555_s7 + $0x268] sm:$0xff] }
  0x5d   : > { %966 = vst [vmem:[%s1580_s22 + $0x1a0] sm:$0xff] %v710_v52  ;;  %967 = vst [vmem:[%s1580_s22 + $0x1a8] sm:$0xff] %v711_v53  ;;  %v719_v7 = vsel %vm461_vm13, %v1566_v4, %v1562_v1  ;;  %v720_v8 = vsel %vm462_vm14, %v1566_v4, %v1562_v1  ;;  %vm463_vm15 = vcmp.gt.f32.partialorder %v207_v59, 0.0  ;;  %vm464_vm0 = vcmp.gt.f32.partialorder %v208_v63, 0.0  ;;  %v222_v27 = vld [vmem:[%s1555_s7 + $0x270] sm:$0xff]  ;;  %v223_v29 = vld [vmem:[%s1555_s7 + $0x278] sm:$0xff] }
  0x5e   : > { %968 = vst [vmem:[%s1580_s22 + $0x1b0] sm:$0xff] %v712_v54  ;;  %969 = vst [vmem:[%s1580_s22 + $0x1b8] sm:$0xff] %v713_v58  ;;  %v721_v12 = vsel %vm463_vm15, %v1566_v4, %v1562_v1  ;;  %vm465_vm1 = vcmp.gt.f32.partialorder %v209_v0, 0.0  ;;  %vm466_vm2 = vcmp.gt.f32.partialorder %v210_v2, 0.0  ;;  %v722_v14 = vsel %vm464_vm0, %v1566_v4, %v1562_v1  ;;  %v224_v33 = vld [vmem:[%s1555_s7 + $0x280] sm:$0xff]  ;;  %v225_v34 = vld [vmem:[%s1555_s7 + $0x288] sm:$0xff] }
  0x5f   : > { %970 = vst [vmem:[%s1580_s22 + $0x1c0] sm:$0xff] %v714_v60  ;;  %971 = vst [vmem:[%s1580_s22 + $0x1c8] sm:$0xff] %v715_v61  ;;  %v723_v15 = vsel %vm465_vm1, %v1566_v4, %v1562_v1  ;;  %v724_v16 = vsel %vm466_vm2, %v1566_v4, %v1562_v1  ;;  %vm467_vm3 = vcmp.gt.f32.partialorder %v211_v5, 0.0  ;;  %vm468_vm4 = vcmp.gt.f32.partialorder %v212_v9, 0.0  ;;  %v226_v35 = vld [vmem:[%s1555_s7 + $0x290] sm:$0xff]  ;;  %v227_v37 = vld [vmem:[%s1555_s7 + $0x298] sm:$0xff] }
  0x60   : > { %972 = vst [vmem:[%s1580_s22 + $0x1d0] sm:$0xff] %v716_v62  ;;  %973 = vst [vmem:[%s1580_s22 + $0x1d8] sm:$0xff] %v717_v3  ;;  %v725_v20 = vsel %vm467_vm3, %v1566_v4, %v1562_v1  ;;  %vm469_vm5 = vcmp.gt.f32.partialorder %v213_v10, 0.0  ;;  %vm470_vm6 = vcmp.gt.f32.partialorder %v214_v11, 0.0  ;;  %v726_v22 = vsel %vm468_vm4, %v1566_v4, %v1562_v1  ;;  %v228_v41 = vld [vmem:[%s1555_s7 + $0x2a0] sm:$0xff]  ;;  %v229_v42 = vld [vmem:[%s1555_s7 + $0x2a8] sm:$0xff] }
  0x61   : > { %974 = vst [vmem:[%s1580_s22 + $0x1e0] sm:$0xff] %v718_v6  ;;  %975 = vst [vmem:[%s1580_s22 + $0x1e8] sm:$0xff] %v719_v7  ;;  %v727_v23 = vsel %vm469_vm5, %v1566_v4, %v1562_v1  ;;  %v728_v24 = vsel %vm470_vm6, %v1566_v4, %v1562_v1  ;;  %vm471_vm7 = vcmp.gt.f32.partialorder %v215_v13, 0.0  ;;  %vm472_vm8 = vcmp.gt.f32.partialorder %v216_v17, 0.0  ;;  %v230_v43 = vld [vmem:[%s1555_s7 + $0x2b0] sm:$0xff]  ;;  %v231_v45 = vld [vmem:[%s1555_s7 + $0x2b8] sm:$0xff] }
  0x62   : > { %976 = vst [vmem:[%s1580_s22 + $0x1f0] sm:$0xff] %v720_v8  ;;  %977 = vst [vmem:[%s1580_s22 + $0x1f8] sm:$0xff] %v721_v12  ;;  %v729_v28 = vsel %vm471_vm7, %v1566_v4, %v1562_v1  ;;  %vm473_vm9 = vcmp.gt.f32.partialorder %v217_v18, 0.0  ;;  %vm474_vm10 = vcmp.gt.f32.partialorder %v218_v19, 0.0  ;;  %v730_v30 = vsel %vm472_vm8, %v1566_v4, %v1562_v1  ;;  %v232_v49 = vld [vmem:[%s1555_s7 + $0x2c0] sm:$0xff]  ;;  %v233_v50 = vld [vmem:[%s1555_s7 + $0x2c8] sm:$0xff] }
  0x63   : > { %978 = vst [vmem:[%s1580_s22 + $0x200] sm:$0xff] %v722_v14  ;;  %979 = vst [vmem:[%s1580_s22 + $0x208] sm:$0xff] %v723_v15  ;;  %v731_v31 = vsel %vm473_vm9, %v1566_v4, %v1562_v1  ;;  %v732_v32 = vsel %vm474_vm10, %v1566_v4, %v1562_v1  ;;  %vm475_vm11 = vcmp.gt.f32.partialorder %v219_v21, 0.0  ;;  %vm476_vm12 = vcmp.gt.f32.partialorder %v220_v25, 0.0  ;;  %v234_v51 = vld [vmem:[%s1555_s7 + $0x2d0] sm:$0xff]  ;;  %v235_v53 = vld [vmem:[%s1555_s7 + $0x2d8] sm:$0xff] }
  0x64   : > { %980 = vst [vmem:[%s1580_s22 + $0x210] sm:$0xff] %v724_v16  ;;  %981 = vst [vmem:[%s1580_s22 + $0x218] sm:$0xff] %v725_v20  ;;  %v733_v36 = vsel %vm475_vm11, %v1566_v4, %v1562_v1  ;;  %vm477_vm13 = vcmp.gt.f32.partialorder %v221_v26, 0.0  ;;  %vm478_vm14 = vcmp.gt.f32.partialorder %v222_v27, 0.0  ;;  %v734_v38 = vsel %vm476_vm12, %v1566_v4, %v1562_v1  ;;  %v236_v57 = vld [vmem:[%s1555_s7 + $0x2e0] sm:$0xff]  ;;  %v237_v58 = vld [vmem:[%s1555_s7 + $0x2e8] sm:$0xff] }
  0x65   : > { %982 = vst [vmem:[%s1580_s22 + $0x220] sm:$0xff] %v726_v22  ;;  %983 = vst [vmem:[%s1580_s22 + $0x228] sm:$0xff] %v727_v23  ;;  %v735_v39 = vsel %vm477_vm13, %v1566_v4, %v1562_v1  ;;  %v736_v40 = vsel %vm478_vm14, %v1566_v4, %v1562_v1  ;;  %vm479_vm15 = vcmp.gt.f32.partialorder %v223_v29, 0.0  ;;  %vm480_vm0 = vcmp.gt.f32.partialorder %v224_v33, 0.0  ;;  %v238_v59 = vld [vmem:[%s1555_s7 + $0x2f0] sm:$0xff]  ;;  %v239_v61 = vld [vmem:[%s1555_s7 + $0x2f8] sm:$0xff] }
  0x66   : > { %984 = vst [vmem:[%s1580_s22 + $0x230] sm:$0xff] %v728_v24  ;;  %985 = vst [vmem:[%s1580_s22 + $0x238] sm:$0xff] %v729_v28  ;;  %v737_v44 = vsel %vm479_vm15, %v1566_v4, %v1562_v1  ;;  %vm481_vm1 = vcmp.gt.f32.partialorder %v225_v34, 0.0  ;;  %vm482_vm2 = vcmp.gt.f32.partialorder %v226_v35, 0.0  ;;  %v738_v46 = vsel %vm480_vm0, %v1566_v4, %v1562_v1  ;;  %v240_v2 = vld [vmem:[%s1555_s7 + $0x300] sm:$0xff]  ;;  %v241_v3 = vld [vmem:[%s1555_s7 + $0x308] sm:$0xff] }
  0x67   : > { %986 = vst [vmem:[%s1580_s22 + $0x240] sm:$0xff] %v730_v30  ;;  %987 = vst [vmem:[%s1580_s22 + $0x248] sm:$0xff] %v731_v31  ;;  %v739_v47 = vsel %vm481_vm1, %v1566_v4, %v1562_v1  ;;  %v740_v48 = vsel %vm482_vm2, %v1566_v4, %v1562_v1  ;;  %vm483_vm3 = vcmp.gt.f32.partialorder %v227_v37, 0.0  ;;  %vm484_vm4 = vcmp.gt.f32.partialorder %v228_v41, 0.0  ;;  %v242_v5 = vld [vmem:[%s1555_s7 + $0x310] sm:$0xff]  ;;  %v243_v7 = vld [vmem:[%s1555_s7 + $0x318] sm:$0xff] }
  0x68   : > { %988 = vst [vmem:[%s1580_s22 + $0x250] sm:$0xff] %v732_v32  ;;  %989 = vst [vmem:[%s1580_s22 + $0x258] sm:$0xff] %v733_v36  ;;  %v741_v52 = vsel %vm483_vm3, %v1566_v4, %v1562_v1  ;;  %vm485_vm5 = vcmp.gt.f32.partialorder %v229_v42, 0.0  ;;  %vm486_vm6 = vcmp.gt.f32.partialorder %v230_v43, 0.0  ;;  %v742_v54 = vsel %vm484_vm4, %v1566_v4, %v1562_v1  ;;  %v244_v11 = vld [vmem:[%s1555_s7 + $0x320] sm:$0xff]  ;;  %v245_v12 = vld [vmem:[%s1555_s7 + $0x328] sm:$0xff] }
  0x69   : > { %990 = vst [vmem:[%s1580_s22 + $0x260] sm:$0xff] %v734_v38  ;;  %991 = vst [vmem:[%s1580_s22 + $0x268] sm:$0xff] %v735_v39  ;;  %v743_v55 = vsel %vm485_vm5, %v1566_v4, %v1562_v1  ;;  %v744_v56 = vsel %vm486_vm6, %v1566_v4, %v1562_v1  ;;  %vm487_vm7 = vcmp.gt.f32.partialorder %v231_v45, 0.0  ;;  %vm488_vm8 = vcmp.gt.f32.partialorder %v232_v49, 0.0  ;;  %v246_v13 = vld [vmem:[%s1555_s7 + $0x330] sm:$0xff]  ;;  %v247_v15 = vld [vmem:[%s1555_s7 + $0x338] sm:$0xff] }
  0x6a   : > { %992 = vst [vmem:[%s1580_s22 + $0x270] sm:$0xff] %v736_v40  ;;  %993 = vst [vmem:[%s1580_s22 + $0x278] sm:$0xff] %v737_v44  ;;  %v745_v60 = vsel %vm487_vm7, %v1566_v4, %v1562_v1  ;;  %vm489_vm9 = vcmp.gt.f32.partialorder %v233_v50, 0.0  ;;  %vm490_vm10 = vcmp.gt.f32.partialorder %v234_v51, 0.0  ;;  %v746_v62 = vsel %vm488_vm8, %v1566_v4, %v1562_v1  ;;  %v248_v19 = vld [vmem:[%s1555_s7 + $0x340] sm:$0xff]  ;;  %v249_v20 = vld [vmem:[%s1555_s7 + $0x348] sm:$0xff] }
  0x6b   : > { %994 = vst [vmem:[%s1580_s22 + $0x280] sm:$0xff] %v738_v46  ;;  %995 = vst [vmem:[%s1580_s22 + $0x288] sm:$0xff] %v739_v47  ;;  %v747_v63 = vsel %vm489_vm9, %v1566_v4, %v1562_v1  ;;  %v748_v0 = vsel %vm490_vm10, %v1566_v4, %v1562_v1  ;;  %vm491_vm11 = vcmp.gt.f32.partialorder %v235_v53, 0.0  ;;  %vm492_vm12 = vcmp.gt.f32.partialorder %v236_v57, 0.0  ;;  %v250_v21 = vld [vmem:[%s1555_s7 + $0x350] sm:$0xff]  ;;  %v251_v23 = vld [vmem:[%s1555_s7 + $0x358] sm:$0xff] }
  0x6c   : > { %996 = vst [vmem:[%s1580_s22 + $0x290] sm:$0xff] %v740_v48  ;;  %997 = vst [vmem:[%s1580_s22 + $0x298] sm:$0xff] %v741_v52  ;;  %v749_v6 = vsel %vm491_vm11, %v1566_v4, %v1562_v1  ;;  %vm493_vm13 = vcmp.gt.f32.partialorder %v237_v58, 0.0  ;;  %vm494_vm14 = vcmp.gt.f32.partialorder %v238_v59, 0.0  ;;  %v750_v8 = vsel %vm492_vm12, %v1566_v4, %v1562_v1  ;;  %v252_v27 = vld [vmem:[%s1555_s7 + $0x360] sm:$0xff]  ;;  %v253_v28 = vld [vmem:[%s1555_s7 + $0x368] sm:$0xff] }
  0x6d   : > { %998 = vst [vmem:[%s1580_s22 + $0x2a0] sm:$0xff] %v742_v54  ;;  %999 = vst [vmem:[%s1580_s22 + $0x2a8] sm:$0xff] %v743_v55  ;;  %v751_v9 = vsel %vm493_vm13, %v1566_v4, %v1562_v1  ;;  %v752_v10 = vsel %vm494_vm14, %v1566_v4, %v1562_v1  ;;  %vm495_vm15 = vcmp.gt.f32.partialorder %v239_v61, 0.0  ;;  %vm496_vm0 = vcmp.gt.f32.partialorder %v240_v2, 0.0  ;;  %v254_v29 = vld [vmem:[%s1555_s7 + $0x370] sm:$0xff]  ;;  %v255_v31 = vld [vmem:[%s1555_s7 + $0x378] sm:$0xff] }
  0x6e   : > { %1000 = vst [vmem:[%s1580_s22 + $0x2b0] sm:$0xff] %v744_v56  ;;  %1001 = vst [vmem:[%s1580_s22 + $0x2b8] sm:$0xff] %v745_v60  ;;  %v753_v14 = vsel %vm495_vm15, %v1566_v4, %v1562_v1  ;;  %vm497_vm1 = vcmp.gt.f32.partialorder %v241_v3, 0.0  ;;  %vm498_vm2 = vcmp.gt.f32.partialorder %v242_v5, 0.0  ;;  %v754_v16 = vsel %vm496_vm0, %v1566_v4, %v1562_v1  ;;  %v256_v35 = vld [vmem:[%s1555_s7 + $0x380] sm:$0xff]  ;;  %v257_v36 = vld [vmem:[%s1555_s7 + $0x388] sm:$0xff] }
  0x6f   : > { %1002 = vst [vmem:[%s1580_s22 + $0x2c0] sm:$0xff] %v746_v62  ;;  %1003 = vst [vmem:[%s1580_s22 + $0x2c8] sm:$0xff] %v747_v63  ;;  %v755_v17 = vsel %vm497_vm1, %v1566_v4, %v1562_v1  ;;  %v756_v18 = vsel %vm498_vm2, %v1566_v4, %v1562_v1  ;;  %vm499_vm3 = vcmp.gt.f32.partialorder %v243_v7, 0.0  ;;  %vm500_vm4 = vcmp.gt.f32.partialorder %v244_v11, 0.0  ;;  %v258_v37 = vld [vmem:[%s1555_s7 + $0x390] sm:$0xff]  ;;  %v259_v39 = vld [vmem:[%s1555_s7 + $0x398] sm:$0xff] }
  0x70   : > { %1004 = vst [vmem:[%s1580_s22 + $0x2d0] sm:$0xff] %v748_v0  ;;  %1005 = vst [vmem:[%s1580_s22 + $0x2d8] sm:$0xff] %v749_v6  ;;  %v757_v22 = vsel %vm499_vm3, %v1566_v4, %v1562_v1  ;;  %vm501_vm5 = vcmp.gt.f32.partialorder %v245_v12, 0.0  ;;  %vm502_vm6 = vcmp.gt.f32.partialorder %v246_v13, 0.0  ;;  %v758_v24 = vsel %vm500_vm4, %v1566_v4, %v1562_v1  ;;  %v260_v43 = vld [vmem:[%s1555_s7 + $0x3a0] sm:$0xff]  ;;  %v261_v44 = vld [vmem:[%s1555_s7 + $0x3a8] sm:$0xff] }
  0x71   : > { %1006 = vst [vmem:[%s1580_s22 + $0x2e0] sm:$0xff] %v750_v8  ;;  %1007 = vst [vmem:[%s1580_s22 + $0x2e8] sm:$0xff] %v751_v9  ;;  %v759_v25 = vsel %vm501_vm5, %v1566_v4, %v1562_v1  ;;  %v760_v26 = vsel %vm502_vm6, %v1566_v4, %v1562_v1  ;;  %vm503_vm7 = vcmp.gt.f32.partialorder %v247_v15, 0.0  ;;  %vm504_vm8 = vcmp.gt.f32.partialorder %v248_v19, 0.0  ;;  %v262_v45 = vld [vmem:[%s1555_s7 + $0x3b0] sm:$0xff]  ;;  %v263_v47 = vld [vmem:[%s1555_s7 + $0x3b8] sm:$0xff] }
  0x72   : > { %1008 = vst [vmem:[%s1580_s22 + $0x2f0] sm:$0xff] %v752_v10  ;;  %1009 = vst [vmem:[%s1580_s22 + $0x2f8] sm:$0xff] %v753_v14  ;;  %v761_v30 = vsel %vm503_vm7, %v1566_v4, %v1562_v1  ;;  %vm505_vm9 = vcmp.gt.f32.partialorder %v249_v20, 0.0  ;;  %vm506_vm10 = vcmp.gt.f32.partialorder %v250_v21, 0.0  ;;  %v762_v32 = vsel %vm504_vm8, %v1566_v4, %v1562_v1  ;;  %v264_v51 = vld [vmem:[%s1555_s7 + $0x3c0] sm:$0xff]  ;;  %v265_v52 = vld [vmem:[%s1555_s7 + $0x3c8] sm:$0xff] }
  0x73   : > { %1010 = vst [vmem:[%s1580_s22 + $0x300] sm:$0xff] %v754_v16  ;;  %1011 = vst [vmem:[%s1580_s22 + $0x308] sm:$0xff] %v755_v17  ;;  %v763_v33 = vsel %vm505_vm9, %v1566_v4, %v1562_v1  ;;  %v764_v34 = vsel %vm506_vm10, %v1566_v4, %v1562_v1  ;;  %vm507_vm11 = vcmp.gt.f32.partialorder %v251_v23, 0.0  ;;  %vm508_vm12 = vcmp.gt.f32.partialorder %v252_v27, 0.0  ;;  %v266_v53 = vld [vmem:[%s1555_s7 + $0x3d0] sm:$0xff]  ;;  %v267_v55 = vld [vmem:[%s1555_s7 + $0x3d8] sm:$0xff] }
  0x74   : > { %1012 = vst [vmem:[%s1580_s22 + $0x310] sm:$0xff] %v756_v18  ;;  %1013 = vst [vmem:[%s1580_s22 + $0x318] sm:$0xff] %v757_v22  ;;  %v765_v38 = vsel %vm507_vm11, %v1566_v4, %v1562_v1  ;;  %vm509_vm13 = vcmp.gt.f32.partialorder %v253_v28, 0.0  ;;  %vm510_vm14 = vcmp.gt.f32.partialorder %v254_v29, 0.0  ;;  %v766_v40 = vsel %vm508_vm12, %v1566_v4, %v1562_v1  ;;  %v268_v59 = vld [vmem:[%s1555_s7 + $0x3e0] sm:$0xff]  ;;  %v269_v60 = vld [vmem:[%s1555_s7 + $0x3e8] sm:$0xff] }
  0x75   : > { %1014 = vst [vmem:[%s1580_s22 + $0x320] sm:$0xff] %v758_v24  ;;  %1015 = vst [vmem:[%s1580_s22 + $0x328] sm:$0xff] %v759_v25  ;;  %v767_v41 = vsel %vm509_vm13, %v1566_v4, %v1562_v1  ;;  %v768_v42 = vsel %vm510_vm14, %v1566_v4, %v1562_v1  ;;  %vm511_vm15 = vcmp.gt.f32.partialorder %v255_v31, 0.0  ;;  %vm512_vm0 = vcmp.gt.f32.partialorder %v256_v35, 0.0  ;;  %v270_v61 = vld [vmem:[%s1555_s7 + $0x3f0] sm:$0xff]  ;;  %v271_v63 = vld [vmem:[%s1555_s7 + $0x3f8] sm:$0xff] }
  0x76   : > { %1016 = vst [vmem:[%s1580_s22 + $0x330] sm:$0xff] %v760_v26  ;;  %1017 = vst [vmem:[%s1580_s22 + $0x338] sm:$0xff] %v761_v30  ;;  %v769_v46 = vsel %vm511_vm15, %v1566_v4, %v1562_v1  ;;  %vm513_vm1 = vcmp.gt.f32.partialorder %v257_v36, 0.0  ;;  %vm514_vm2 = vcmp.gt.f32.partialorder %v258_v37, 0.0  ;;  %v770_v48 = vsel %vm512_vm0, %v1566_v4, %v1562_v1  ;;  %v272_v5 = vld [vmem:[%s1555_s7 + $0x400] sm:$0xff]  ;;  %v273_v6 = vld [vmem:[%s1555_s7 + $0x408] sm:$0xff] }
  0x77   : > { %1018 = vst [vmem:[%s1580_s22 + $0x340] sm:$0xff] %v762_v32  ;;  %1019 = vst [vmem:[%s1580_s22 + $0x348] sm:$0xff] %v763_v33  ;;  %v771_v49 = vsel %vm513_vm1, %v1566_v4, %v1562_v1  ;;  %v772_v50 = vsel %vm514_vm2, %v1566_v4, %v1562_v1  ;;  %vm515_vm3 = vcmp.gt.f32.partialorder %v259_v39, 0.0  ;;  %vm516_vm4 = vcmp.gt.f32.partialorder %v260_v43, 0.0  ;;  %v274_v7 = vld [vmem:[%s1555_s7 + $0x410] sm:$0xff]  ;;  %v275_v9 = vld [vmem:[%s1555_s7 + $0x418] sm:$0xff] }
  0x78   : > { %1020 = vst [vmem:[%s1580_s22 + $0x350] sm:$0xff] %v764_v34  ;;  %1021 = vst [vmem:[%s1580_s22 + $0x358] sm:$0xff] %v765_v38  ;;  %v773_v54 = vsel %vm515_vm3, %v1566_v4, %v1562_v1  ;;  %vm517_vm5 = vcmp.gt.f32.partialorder %v261_v44, 0.0  ;;  %vm518_vm6 = vcmp.gt.f32.partialorder %v262_v45, 0.0  ;;  %v774_v56 = vsel %vm516_vm4, %v1566_v4, %v1562_v1  ;;  %v276_v13 = vld [vmem:[%s1555_s7 + $0x420] sm:$0xff]  ;;  %v277_v14 = vld [vmem:[%s1555_s7 + $0x428] sm:$0xff] }
  0x79   : > { %1022 = vst [vmem:[%s1580_s22 + $0x360] sm:$0xff] %v766_v40  ;;  %1023 = vst [vmem:[%s1580_s22 + $0x368] sm:$0xff] %v767_v41  ;;  %v775_v57 = vsel %vm517_vm5, %v1566_v4, %v1562_v1  ;;  %v776_v58 = vsel %vm518_vm6, %v1566_v4, %v1562_v1  ;;  %vm519_vm7 = vcmp.gt.f32.partialorder %v263_v47, 0.0  ;;  %vm520_vm8 = vcmp.gt.f32.partialorder %v264_v51, 0.0  ;;  %v278_v15 = vld [vmem:[%s1555_s7 + $0x430] sm:$0xff]  ;;  %v279_v17 = vld [vmem:[%s1555_s7 + $0x438] sm:$0xff] }
  0x7a   : > { %1024 = vst [vmem:[%s1580_s22 + $0x370] sm:$0xff] %v768_v42  ;;  %1025 = vst [vmem:[%s1580_s22 + $0x378] sm:$0xff] %v769_v46  ;;  %v777_v62 = vsel %vm519_vm7, %v1566_v4, %v1562_v1  ;;  %vm521_vm9 = vcmp.gt.f32.partialorder %v265_v52, 0.0  ;;  %vm522_vm10 = vcmp.gt.f32.partialorder %v266_v53, 0.0  ;;  %v778_v0 = vsel %vm520_vm8, %v1566_v4, %v1562_v1  ;;  %v280_v21 = vld [vmem:[%s1555_s7 + $0x440] sm:$0xff]  ;;  %v281_v22 = vld [vmem:[%s1555_s7 + $0x448] sm:$0xff] }
  0x7b   : > { %1026 = vst [vmem:[%s1580_s22 + $0x380] sm:$0xff] %v770_v48  ;;  %1027 = vst [vmem:[%s1580_s22 + $0x388] sm:$0xff] %v771_v49  ;;  %v779_v2 = vsel %vm521_vm9, %v1566_v4, %v1562_v1  ;;  %v780_v3 = vsel %vm522_vm10, %v1566_v4, %v1562_v1  ;;  %vm523_vm11 = vcmp.gt.f32.partialorder %v267_v55, 0.0  ;;  %vm524_vm12 = vcmp.gt.f32.partialorder %v268_v59, 0.0  ;;  %v282_v23 = vld [vmem:[%s1555_s7 + $0x450] sm:$0xff]  ;;  %v283_v25 = vld [vmem:[%s1555_s7 + $0x458] sm:$0xff] }
  0x7c   : > { %1028 = vst [vmem:[%s1580_s22 + $0x390] sm:$0xff] %v772_v50  ;;  %1029 = vst [vmem:[%s1580_s22 + $0x398] sm:$0xff] %v773_v54  ;;  %v781_v8 = vsel %vm523_vm11, %v1566_v4, %v1562_v1  ;;  %vm525_vm13 = vcmp.gt.f32.partialorder %v269_v60, 0.0  ;;  %vm526_vm14 = vcmp.gt.f32.partialorder %v270_v61, 0.0  ;;  %v782_v10 = vsel %vm524_vm12, %v1566_v4, %v1562_v1  ;;  %v284_v29 = vld [vmem:[%s1555_s7 + $0x460] sm:$0xff]  ;;  %v285_v30 = vld [vmem:[%s1555_s7 + $0x468] sm:$0xff] }
  0x7d   : > { %1030 = vst [vmem:[%s1580_s22 + $0x3a0] sm:$0xff] %v774_v56  ;;  %1031 = vst [vmem:[%s1580_s22 + $0x3a8] sm:$0xff] %v775_v57  ;;  %v783_v11 = vsel %vm525_vm13, %v1566_v4, %v1562_v1  ;;  %v784_v12 = vsel %vm526_vm14, %v1566_v4, %v1562_v1  ;;  %vm527_vm15 = vcmp.gt.f32.partialorder %v271_v63, 0.0  ;;  %vm528_vm0 = vcmp.gt.f32.partialorder %v272_v5, 0.0  ;;  %v286_v31 = vld [vmem:[%s1555_s7 + $0x470] sm:$0xff]  ;;  %v287_v33 = vld [vmem:[%s1555_s7 + $0x478] sm:$0xff] }
  0x7e   : > { %1032 = vst [vmem:[%s1580_s22 + $0x3b0] sm:$0xff] %v776_v58  ;;  %1033 = vst [vmem:[%s1580_s22 + $0x3b8] sm:$0xff] %v777_v62  ;;  %v785_v16 = vsel %vm527_vm15, %v1566_v4, %v1562_v1  ;;  %vm529_vm1 = vcmp.gt.f32.partialorder %v273_v6, 0.0  ;;  %vm530_vm2 = vcmp.gt.f32.partialorder %v274_v7, 0.0  ;;  %v786_v18 = vsel %vm528_vm0, %v1566_v4, %v1562_v1  ;;  %v288_v37 = vld [vmem:[%s1555_s7 + $0x480] sm:$0xff]  ;;  %v289_v38 = vld [vmem:[%s1555_s7 + $0x488] sm:$0xff] }
  0x7f   : > { %1034 = vst [vmem:[%s1580_s22 + $0x3c0] sm:$0xff] %v778_v0  ;;  %1035 = vst [vmem:[%s1580_s22 + $0x3c8] sm:$0xff] %v779_v2  ;;  %v787_v19 = vsel %vm529_vm1, %v1566_v4, %v1562_v1  ;;  %v788_v20 = vsel %vm530_vm2, %v1566_v4, %v1562_v1  ;;  %vm531_vm3 = vcmp.gt.f32.partialorder %v275_v9, 0.0  ;;  %vm532_vm4 = vcmp.gt.f32.partialorder %v276_v13, 0.0  ;;  %v290_v39 = vld [vmem:[%s1555_s7 + $0x490] sm:$0xff]  ;;  %v291_v41 = vld [vmem:[%s1555_s7 + $0x498] sm:$0xff] }
  0x80   : > { %1036 = vst [vmem:[%s1580_s22 + $0x3d0] sm:$0xff] %v780_v3  ;;  %1037 = vst [vmem:[%s1580_s22 + $0x3d8] sm:$0xff] %v781_v8  ;;  %v789_v24 = vsel %vm531_vm3, %v1566_v4, %v1562_v1  ;;  %vm533_vm5 = vcmp.gt.f32.partialorder %v277_v14, 0.0  ;;  %vm534_vm6 = vcmp.gt.f32.partialorder %v278_v15, 0.0  ;;  %v790_v26 = vsel %vm532_vm4, %v1566_v4, %v1562_v1  ;;  %v292_v45 = vld [vmem:[%s1555_s7 + $0x4a0] sm:$0xff]  ;;  %v293_v46 = vld [vmem:[%s1555_s7 + $0x4a8] sm:$0xff] }
  0x81   : > { %1038 = vst [vmem:[%s1580_s22 + $0x3e0] sm:$0xff] %v782_v10  ;;  %1039 = vst [vmem:[%s1580_s22 + $0x3e8] sm:$0xff] %v783_v11  ;;  %v791_v27 = vsel %vm533_vm5, %v1566_v4, %v1562_v1  ;;  %v792_v28 = vsel %vm534_vm6, %v1566_v4, %v1562_v1  ;;  %vm535_vm7 = vcmp.gt.f32.partialorder %v279_v17, 0.0  ;;  %vm536_vm8 = vcmp.gt.f32.partialorder %v280_v21, 0.0  ;;  %v294_v47 = vld [vmem:[%s1555_s7 + $0x4b0] sm:$0xff]  ;;  %v295_v49 = vld [vmem:[%s1555_s7 + $0x4b8] sm:$0xff] }
  0x82   : > { %1040 = vst [vmem:[%s1580_s22 + $0x3f0] sm:$0xff] %v784_v12  ;;  %1041 = vst [vmem:[%s1580_s22 + $0x3f8] sm:$0xff] %v785_v16  ;;  %v793_v32 = vsel %vm535_vm7, %v1566_v4, %v1562_v1  ;;  %vm537_vm9 = vcmp.gt.f32.partialorder %v281_v22, 0.0  ;;  %vm538_vm10 = vcmp.gt.f32.partialorder %v282_v23, 0.0  ;;  %v794_v34 = vsel %vm536_vm8, %v1566_v4, %v1562_v1  ;;  %v296_v53 = vld [vmem:[%s1555_s7 + $0x4c0] sm:$0xff]  ;;  %v297_v54 = vld [vmem:[%s1555_s7 + $0x4c8] sm:$0xff] }
  0x83   : > { %1042 = vst [vmem:[%s1580_s22 + $0x400] sm:$0xff] %v786_v18  ;;  %1043 = vst [vmem:[%s1580_s22 + $0x408] sm:$0xff] %v787_v19  ;;  %v795_v35 = vsel %vm537_vm9, %v1566_v4, %v1562_v1  ;;  %v796_v36 = vsel %vm538_vm10, %v1566_v4, %v1562_v1  ;;  %vm539_vm11 = vcmp.gt.f32.partialorder %v283_v25, 0.0  ;;  %vm540_vm12 = vcmp.gt.f32.partialorder %v284_v29, 0.0  ;;  %v298_v55 = vld [vmem:[%s1555_s7 + $0x4d0] sm:$0xff]  ;;  %v299_v57 = vld [vmem:[%s1555_s7 + $0x4d8] sm:$0xff] }
  0x84   : > { %1044 = vst [vmem:[%s1580_s22 + $0x410] sm:$0xff] %v788_v20  ;;  %1045 = vst [vmem:[%s1580_s22 + $0x418] sm:$0xff] %v789_v24  ;;  %v797_v40 = vsel %vm539_vm11, %v1566_v4, %v1562_v1  ;;  %vm541_vm13 = vcmp.gt.f32.partialorder %v285_v30, 0.0  ;;  %vm542_vm14 = vcmp.gt.f32.partialorder %v286_v31, 0.0  ;;  %v798_v42 = vsel %vm540_vm12, %v1566_v4, %v1562_v1  ;;  %v300_v61 = vld [vmem:[%s1555_s7 + $0x4e0] sm:$0xff]  ;;  %v301_v62 = vld [vmem:[%s1555_s7 + $0x4e8] sm:$0xff] }
  0x85   : > { %1046 = vst [vmem:[%s1580_s22 + $0x420] sm:$0xff] %v790_v26  ;;  %1047 = vst [vmem:[%s1580_s22 + $0x428] sm:$0xff] %v791_v27  ;;  %v799_v43 = vsel %vm541_vm13, %v1566_v4, %v1562_v1  ;;  %v800_v44 = vsel %vm542_vm14, %v1566_v4, %v1562_v1  ;;  %vm543_vm15 = vcmp.gt.f32.partialorder %v287_v33, 0.0  ;;  %vm544_vm0 = vcmp.gt.f32.partialorder %v288_v37, 0.0  ;;  %v302_v63 = vld [vmem:[%s1555_s7 + $0x4f0] sm:$0xff]  ;;  %v303_v2 = vld [vmem:[%s1555_s7 + $0x4f8] sm:$0xff] }
  0x86   : > { %1048 = vst [vmem:[%s1580_s22 + $0x430] sm:$0xff] %v792_v28  ;;  %1049 = vst [vmem:[%s1580_s22 + $0x438] sm:$0xff] %v793_v32  ;;  %v801_v48 = vsel %vm543_vm15, %v1566_v4, %v1562_v1  ;;  %vm545_vm1 = vcmp.gt.f32.partialorder %v289_v38, 0.0  ;;  %vm546_vm2 = vcmp.gt.f32.partialorder %v290_v39, 0.0  ;;  %v802_v50 = vsel %vm544_vm0, %v1566_v4, %v1562_v1  ;;  %v304_v7 = vld [vmem:[%s1555_s7 + $0x500] sm:$0xff]  ;;  %v305_v8 = vld [vmem:[%s1555_s7 + $0x508] sm:$0xff] }
  0x87   : > { %1050 = vst [vmem:[%s1580_s22 + $0x440] sm:$0xff] %v794_v34  ;;  %1051 = vst [vmem:[%s1580_s22 + $0x448] sm:$0xff] %v795_v35  ;;  %v803_v51 = vsel %vm545_vm1, %v1566_v4, %v1562_v1  ;;  %v804_v52 = vsel %vm546_vm2, %v1566_v4, %v1562_v1  ;;  %vm547_vm3 = vcmp.gt.f32.partialorder %v291_v41, 0.0  ;;  %vm548_vm4 = vcmp.gt.f32.partialorder %v292_v45, 0.0  ;;  %v306_v9 = vld [vmem:[%s1555_s7 + $0x510] sm:$0xff]  ;;  %v307_v11 = vld [vmem:[%s1555_s7 + $0x518] sm:$0xff] }
  0x88   : > { %1052 = vst [vmem:[%s1580_s22 + $0x450] sm:$0xff] %v796_v36  ;;  %1053 = vst [vmem:[%s1580_s22 + $0x458] sm:$0xff] %v797_v40  ;;  %v805_v56 = vsel %vm547_vm3, %v1566_v4, %v1562_v1  ;;  %vm549_vm5 = vcmp.gt.f32.partialorder %v293_v46, 0.0  ;;  %vm550_vm6 = vcmp.gt.f32.partialorder %v294_v47, 0.0  ;;  %v806_v58 = vsel %vm548_vm4, %v1566_v4, %v1562_v1  ;;  %v308_v15 = vld [vmem:[%s1555_s7 + $0x520] sm:$0xff]  ;;  %v309_v16 = vld [vmem:[%s1555_s7 + $0x528] sm:$0xff] }
  0x89   : > { %1054 = vst [vmem:[%s1580_s22 + $0x460] sm:$0xff] %v798_v42  ;;  %1055 = vst [vmem:[%s1580_s22 + $0x468] sm:$0xff] %v799_v43  ;;  %v807_v59 = vsel %vm549_vm5, %v1566_v4, %v1562_v1  ;;  %v808_v60 = vsel %vm550_vm6, %v1566_v4, %v1562_v1  ;;  %vm551_vm7 = vcmp.gt.f32.partialorder %v295_v49, 0.0  ;;  %vm552_vm8 = vcmp.gt.f32.partialorder %v296_v53, 0.0  ;;  %v310_v17 = vld [vmem:[%s1555_s7 + $0x530] sm:$0xff]  ;;  %v311_v19 = vld [vmem:[%s1555_s7 + $0x538] sm:$0xff] }
  0x8a   : > { %1056 = vst [vmem:[%s1580_s22 + $0x470] sm:$0xff] %v800_v44  ;;  %1057 = vst [vmem:[%s1580_s22 + $0x478] sm:$0xff] %v801_v48  ;;  %v809_v0 = vsel %vm551_vm7, %v1566_v4, %v1562_v1  ;;  %vm553_vm9 = vcmp.gt.f32.partialorder %v297_v54, 0.0  ;;  %vm554_vm10 = vcmp.gt.f32.partialorder %v298_v55, 0.0  ;;  %v810_v3 = vsel %vm552_vm8, %v1566_v4, %v1562_v1  ;;  %v312_v23 = vld [vmem:[%s1555_s7 + $0x540] sm:$0xff]  ;;  %v313_v24 = vld [vmem:[%s1555_s7 + $0x548] sm:$0xff] }
  0x8b   : > { %1058 = vst [vmem:[%s1580_s22 + $0x480] sm:$0xff] %v802_v50  ;;  %1059 = vst [vmem:[%s1580_s22 + $0x488] sm:$0xff] %v803_v51  ;;  %v811_v5 = vsel %vm553_vm9, %v1566_v4, %v1562_v1  ;;  %v812_v6 = vsel %vm554_vm10, %v1566_v4, %v1562_v1  ;;  %vm555_vm11 = vcmp.gt.f32.partialorder %v299_v57, 0.0  ;;  %vm556_vm12 = vcmp.gt.f32.partialorder %v300_v61, 0.0  ;;  %v314_v25 = vld [vmem:[%s1555_s7 + $0x550] sm:$0xff]  ;;  %v315_v27 = vld [vmem:[%s1555_s7 + $0x558] sm:$0xff] }
  0x8c   : > { %1060 = vst [vmem:[%s1580_s22 + $0x490] sm:$0xff] %v804_v52  ;;  %1061 = vst [vmem:[%s1580_s22 + $0x498] sm:$0xff] %v805_v56  ;;  %v813_v10 = vsel %vm555_vm11, %v1566_v4, %v1562_v1  ;;  %vm557_vm13 = vcmp.gt.f32.partialorder %v301_v62, 0.0  ;;  %vm558_vm14 = vcmp.gt.f32.partialorder %v302_v63, 0.0  ;;  %v814_v12 = vsel %vm556_vm12, %v1566_v4, %v1562_v1  ;;  %v316_v31 = vld [vmem:[%s1555_s7 + $0x560] sm:$0xff]  ;;  %v317_v32 = vld [vmem:[%s1555_s7 + $0x568] sm:$0xff] }
  0x8d   : > { %1062 = vst [vmem:[%s1580_s22 + $0x4a0] sm:$0xff] %v806_v58  ;;  %1063 = vst [vmem:[%s1580_s22 + $0x4a8] sm:$0xff] %v807_v59  ;;  %v815_v13 = vsel %vm557_vm13, %v1566_v4, %v1562_v1  ;;  %v816_v14 = vsel %vm558_vm14, %v1566_v4, %v1562_v1  ;;  %vm559_vm15 = vcmp.gt.f32.partialorder %v303_v2, 0.0  ;;  %vm560_vm0 = vcmp.gt.f32.partialorder %v304_v7, 0.0  ;;  %v318_v33 = vld [vmem:[%s1555_s7 + $0x570] sm:$0xff]  ;;  %v319_v35 = vld [vmem:[%s1555_s7 + $0x578] sm:$0xff] }
  0x8e   : > { %1064 = vst [vmem:[%s1580_s22 + $0x4b0] sm:$0xff] %v808_v60  ;;  %1065 = vst [vmem:[%s1580_s22 + $0x4b8] sm:$0xff] %v809_v0  ;;  %v817_v18 = vsel %vm559_vm15, %v1566_v4, %v1562_v1  ;;  %vm561_vm1 = vcmp.gt.f32.partialorder %v305_v8, 0.0  ;;  %vm562_vm2 = vcmp.gt.f32.partialorder %v306_v9, 0.0  ;;  %v818_v20 = vsel %vm560_vm0, %v1566_v4, %v1562_v1  ;;  %v320_v39 = vld [vmem:[%s1555_s7 + $0x580] sm:$0xff]  ;;  %v321_v40 = vld [vmem:[%s1555_s7 + $0x588] sm:$0xff] }
  0x8f   : > { %1066 = vst [vmem:[%s1580_s22 + $0x4c0] sm:$0xff] %v810_v3  ;;  %1067 = vst [vmem:[%s1580_s22 + $0x4c8] sm:$0xff] %v811_v5  ;;  %v819_v21 = vsel %vm561_vm1, %v1566_v4, %v1562_v1  ;;  %v820_v22 = vsel %vm562_vm2, %v1566_v4, %v1562_v1  ;;  %vm563_vm3 = vcmp.gt.f32.partialorder %v307_v11, 0.0  ;;  %vm564_vm4 = vcmp.gt.f32.partialorder %v308_v15, 0.0  ;;  %v322_v41 = vld [vmem:[%s1555_s7 + $0x590] sm:$0xff]  ;;  %v323_v43 = vld [vmem:[%s1555_s7 + $0x598] sm:$0xff] }
  0x90   : > { %1068 = vst [vmem:[%s1580_s22 + $0x4d0] sm:$0xff] %v812_v6  ;;  %1069 = vst [vmem:[%s1580_s22 + $0x4d8] sm:$0xff] %v813_v10  ;;  %v821_v26 = vsel %vm563_vm3, %v1566_v4, %v1562_v1  ;;  %vm565_vm5 = vcmp.gt.f32.partialorder %v309_v16, 0.0  ;;  %vm566_vm6 = vcmp.gt.f32.partialorder %v310_v17, 0.0  ;;  %v822_v28 = vsel %vm564_vm4, %v1566_v4, %v1562_v1  ;;  %v324_v47 = vld [vmem:[%s1555_s7 + $0x5a0] sm:$0xff]  ;;  %v325_v48 = vld [vmem:[%s1555_s7 + $0x5a8] sm:$0xff] }
  0x91   : > { %1070 = vst [vmem:[%s1580_s22 + $0x4e0] sm:$0xff] %v814_v12  ;;  %1071 = vst [vmem:[%s1580_s22 + $0x4e8] sm:$0xff] %v815_v13  ;;  %v823_v29 = vsel %vm565_vm5, %v1566_v4, %v1562_v1  ;;  %v824_v30 = vsel %vm566_vm6, %v1566_v4, %v1562_v1  ;;  %vm567_vm7 = vcmp.gt.f32.partialorder %v311_v19, 0.0  ;;  %vm568_vm8 = vcmp.gt.f32.partialorder %v312_v23, 0.0  ;;  %v326_v49 = vld [vmem:[%s1555_s7 + $0x5b0] sm:$0xff]  ;;  %v327_v51 = vld [vmem:[%s1555_s7 + $0x5b8] sm:$0xff] }
  0x92   : > { %1072 = vst [vmem:[%s1580_s22 + $0x4f0] sm:$0xff] %v816_v14  ;;  %1073 = vst [vmem:[%s1580_s22 + $0x4f8] sm:$0xff] %v817_v18  ;;  %v825_v34 = vsel %vm567_vm7, %v1566_v4, %v1562_v1  ;;  %vm569_vm9 = vcmp.gt.f32.partialorder %v313_v24, 0.0  ;;  %vm570_vm10 = vcmp.gt.f32.partialorder %v314_v25, 0.0  ;;  %v826_v36 = vsel %vm568_vm8, %v1566_v4, %v1562_v1  ;;  %v328_v55 = vld [vmem:[%s1555_s7 + $0x5c0] sm:$0xff]  ;;  %v329_v56 = vld [vmem:[%s1555_s7 + $0x5c8] sm:$0xff] }
  0x93   : > { %1074 = vst [vmem:[%s1580_s22 + $0x500] sm:$0xff] %v818_v20  ;;  %1075 = vst [vmem:[%s1580_s22 + $0x508] sm:$0xff] %v819_v21  ;;  %v827_v37 = vsel %vm569_vm9, %v1566_v4, %v1562_v1  ;;  %v828_v38 = vsel %vm570_vm10, %v1566_v4, %v1562_v1  ;;  %vm571_vm11 = vcmp.gt.f32.partialorder %v315_v27, 0.0  ;;  %vm572_vm12 = vcmp.gt.f32.partialorder %v316_v31, 0.0  ;;  %v330_v57 = vld [vmem:[%s1555_s7 + $0x5d0] sm:$0xff]  ;;  %v331_v59 = vld [vmem:[%s1555_s7 + $0x5d8] sm:$0xff] }
  0x94   : > { %1076 = vst [vmem:[%s1580_s22 + $0x510] sm:$0xff] %v820_v22  ;;  %1077 = vst [vmem:[%s1580_s22 + $0x518] sm:$0xff] %v821_v26  ;;  %v829_v42 = vsel %vm571_vm11, %v1566_v4, %v1562_v1  ;;  %vm573_vm13 = vcmp.gt.f32.partialorder %v317_v32, 0.0  ;;  %vm574_vm14 = vcmp.gt.f32.partialorder %v318_v33, 0.0  ;;  %v830_v44 = vsel %vm572_vm12, %v1566_v4, %v1562_v1  ;;  %v332_v63 = vld [vmem:[%s1555_s7 + $0x5e0] sm:$0xff]  ;;  %v333_v0 = vld [vmem:[%s1555_s7 + $0x5e8] sm:$0xff] }
  0x95   : > { %1078 = vst [vmem:[%s1580_s22 + $0x520] sm:$0xff] %v822_v28  ;;  %1079 = vst [vmem:[%s1580_s22 + $0x528] sm:$0xff] %v823_v29  ;;  %v831_v45 = vsel %vm573_vm13, %v1566_v4, %v1562_v1  ;;  %v832_v46 = vsel %vm574_vm14, %v1566_v4, %v1562_v1  ;;  %vm575_vm15 = vcmp.gt.f32.partialorder %v319_v35, 0.0  ;;  %vm576_vm0 = vcmp.gt.f32.partialorder %v320_v39, 0.0  ;;  %v334_v2 = vld [vmem:[%s1555_s7 + $0x5f0] sm:$0xff]  ;;  %v335_v5 = vld [vmem:[%s1555_s7 + $0x5f8] sm:$0xff] }
  0x96   : > { %1080 = vst [vmem:[%s1580_s22 + $0x530] sm:$0xff] %v824_v30  ;;  %1081 = vst [vmem:[%s1580_s22 + $0x538] sm:$0xff] %v825_v34  ;;  %v833_v50 = vsel %vm575_vm15, %v1566_v4, %v1562_v1  ;;  %vm577_vm1 = vcmp.gt.f32.partialorder %v321_v40, 0.0  ;;  %vm578_vm2 = vcmp.gt.f32.partialorder %v322_v41, 0.0  ;;  %v834_v52 = vsel %vm576_vm0, %v1566_v4, %v1562_v1  ;;  %v336_v9 = vld [vmem:[%s1555_s7 + $0x600] sm:$0xff]  ;;  %v337_v10 = vld [vmem:[%s1555_s7 + $0x608] sm:$0xff] }
  0x97   : > { %1082 = vst [vmem:[%s1580_s22 + $0x540] sm:$0xff] %v826_v36  ;;  %1083 = vst [vmem:[%s1580_s22 + $0x548] sm:$0xff] %v827_v37  ;;  %v835_v53 = vsel %vm577_vm1, %v1566_v4, %v1562_v1  ;;  %v836_v54 = vsel %vm578_vm2, %v1566_v4, %v1562_v1  ;;  %vm579_vm3 = vcmp.gt.f32.partialorder %v323_v43, 0.0  ;;  %vm580_vm4 = vcmp.gt.f32.partialorder %v324_v47, 0.0  ;;  %v338_v11 = vld [vmem:[%s1555_s7 + $0x610] sm:$0xff]  ;;  %v339_v13 = vld [vmem:[%s1555_s7 + $0x618] sm:$0xff] }
  0x98   : > { %1084 = vst [vmem:[%s1580_s22 + $0x550] sm:$0xff] %v828_v38  ;;  %1085 = vst [vmem:[%s1580_s22 + $0x558] sm:$0xff] %v829_v42  ;;  %v837_v58 = vsel %vm579_vm3, %v1566_v4, %v1562_v1  ;;  %vm581_vm5 = vcmp.gt.f32.partialorder %v325_v48, 0.0  ;;  %vm582_vm6 = vcmp.gt.f32.partialorder %v326_v49, 0.0  ;;  %v838_v60 = vsel %vm580_vm4, %v1566_v4, %v1562_v1  ;;  %v340_v17 = vld [vmem:[%s1555_s7 + $0x620] sm:$0xff]  ;;  %v341_v18 = vld [vmem:[%s1555_s7 + $0x628] sm:$0xff] }
  0x99   : > { %1086 = vst [vmem:[%s1580_s22 + $0x560] sm:$0xff] %v830_v44  ;;  %1087 = vst [vmem:[%s1580_s22 + $0x568] sm:$0xff] %v831_v45  ;;  %v839_v61 = vsel %vm581_vm5, %v1566_v4, %v1562_v1  ;;  %v840_v62 = vsel %vm582_vm6, %v1566_v4, %v1562_v1  ;;  %vm583_vm7 = vcmp.gt.f32.partialorder %v327_v51, 0.0  ;;  %vm584_vm8 = vcmp.gt.f32.partialorder %v328_v55, 0.0  ;;  %v342_v19 = vld [vmem:[%s1555_s7 + $0x630] sm:$0xff]  ;;  %v343_v21 = vld [vmem:[%s1555_s7 + $0x638] sm:$0xff] }
  0x9a   : > { %1088 = vst [vmem:[%s1580_s22 + $0x570] sm:$0xff] %v832_v46  ;;  %1089 = vst [vmem:[%s1580_s22 + $0x578] sm:$0xff] %v833_v50  ;;  %v841_v3 = vsel %vm583_vm7, %v1566_v4, %v1562_v1  ;;  %vm585_vm9 = vcmp.gt.f32.partialorder %v329_v56, 0.0  ;;  %vm586_vm10 = vcmp.gt.f32.partialorder %v330_v57, 0.0  ;;  %v842_v6 = vsel %vm584_vm8, %v1566_v4, %v1562_v1  ;;  %v344_v25 = vld [vmem:[%s1555_s7 + $0x640] sm:$0xff]  ;;  %v345_v26 = vld [vmem:[%s1555_s7 + $0x648] sm:$0xff] }
  0x9b   : > { %1090 = vst [vmem:[%s1580_s22 + $0x580] sm:$0xff] %v834_v52  ;;  %1091 = vst [vmem:[%s1580_s22 + $0x588] sm:$0xff] %v835_v53  ;;  %v843_v7 = vsel %vm585_vm9, %v1566_v4, %v1562_v1  ;;  %v844_v8 = vsel %vm586_vm10, %v1566_v4, %v1562_v1  ;;  %vm587_vm11 = vcmp.gt.f32.partialorder %v331_v59, 0.0  ;;  %vm588_vm12 = vcmp.gt.f32.partialorder %v332_v63, 0.0  ;;  %v346_v27 = vld [vmem:[%s1555_s7 + $0x650] sm:$0xff]  ;;  %v347_v29 = vld [vmem:[%s1555_s7 + $0x658] sm:$0xff] }
  0x9c   : > { %1092 = vst [vmem:[%s1580_s22 + $0x590] sm:$0xff] %v836_v54  ;;  %1093 = vst [vmem:[%s1580_s22 + $0x598] sm:$0xff] %v837_v58  ;;  %v845_v12 = vsel %vm587_vm11, %v1566_v4, %v1562_v1  ;;  %vm589_vm13 = vcmp.gt.f32.partialorder %v333_v0, 0.0  ;;  %vm590_vm14 = vcmp.gt.f32.partialorder %v334_v2, 0.0  ;;  %v846_v14 = vsel %vm588_vm12, %v1566_v4, %v1562_v1  ;;  %v348_v33 = vld [vmem:[%s1555_s7 + $0x660] sm:$0xff]  ;;  %v349_v34 = vld [vmem:[%s1555_s7 + $0x668] sm:$0xff] }
  0x9d   : > { %1094 = vst [vmem:[%s1580_s22 + $0x5a0] sm:$0xff] %v838_v60  ;;  %1095 = vst [vmem:[%s1580_s22 + $0x5a8] sm:$0xff] %v839_v61  ;;  %v847_v15 = vsel %vm589_vm13, %v1566_v4, %v1562_v1  ;;  %v848_v16 = vsel %vm590_vm14, %v1566_v4, %v1562_v1  ;;  %vm591_vm15 = vcmp.gt.f32.partialorder %v335_v5, 0.0  ;;  %vm592_vm0 = vcmp.gt.f32.partialorder %v336_v9, 0.0  ;;  %v350_v35 = vld [vmem:[%s1555_s7 + $0x670] sm:$0xff]  ;;  %v351_v37 = vld [vmem:[%s1555_s7 + $0x678] sm:$0xff] }
  0x9e   : > { %1096 = vst [vmem:[%s1580_s22 + $0x5b0] sm:$0xff] %v840_v62  ;;  %1097 = vst [vmem:[%s1580_s22 + $0x5b8] sm:$0xff] %v841_v3  ;;  %v849_v20 = vsel %vm591_vm15, %v1566_v4, %v1562_v1  ;;  %vm593_vm1 = vcmp.gt.f32.partialorder %v337_v10, 0.0  ;;  %vm594_vm2 = vcmp.gt.f32.partialorder %v338_v11, 0.0  ;;  %v850_v22 = vsel %vm592_vm0, %v1566_v4, %v1562_v1  ;;  %v352_v41 = vld [vmem:[%s1555_s7 + $0x680] sm:$0xff]  ;;  %v353_v42 = vld [vmem:[%s1555_s7 + $0x688] sm:$0xff] }
  0x9f   : > { %1098 = vst [vmem:[%s1580_s22 + $0x5c0] sm:$0xff] %v842_v6  ;;  %1099 = vst [vmem:[%s1580_s22 + $0x5c8] sm:$0xff] %v843_v7  ;;  %v851_v23 = vsel %vm593_vm1, %v1566_v4, %v1562_v1  ;;  %v852_v24 = vsel %vm594_vm2, %v1566_v4, %v1562_v1  ;;  %vm595_vm3 = vcmp.gt.f32.partialorder %v339_v13, 0.0  ;;  %vm596_vm4 = vcmp.gt.f32.partialorder %v340_v17, 0.0  ;;  %v354_v43 = vld [vmem:[%s1555_s7 + $0x690] sm:$0xff]  ;;  %v355_v45 = vld [vmem:[%s1555_s7 + $0x698] sm:$0xff] }
  0xa0   : > { %1100 = vst [vmem:[%s1580_s22 + $0x5d0] sm:$0xff] %v844_v8  ;;  %1101 = vst [vmem:[%s1580_s22 + $0x5d8] sm:$0xff] %v845_v12  ;;  %v853_v28 = vsel %vm595_vm3, %v1566_v4, %v1562_v1  ;;  %vm597_vm5 = vcmp.gt.f32.partialorder %v341_v18, 0.0  ;;  %vm598_vm6 = vcmp.gt.f32.partialorder %v342_v19, 0.0  ;;  %v854_v30 = vsel %vm596_vm4, %v1566_v4, %v1562_v1  ;;  %v356_v49 = vld [vmem:[%s1555_s7 + $0x6a0] sm:$0xff]  ;;  %v357_v50 = vld [vmem:[%s1555_s7 + $0x6a8] sm:$0xff] }
  0xa1   : > { %1102 = vst [vmem:[%s1580_s22 + $0x5e0] sm:$0xff] %v846_v14  ;;  %1103 = vst [vmem:[%s1580_s22 + $0x5e8] sm:$0xff] %v847_v15  ;;  %v855_v31 = vsel %vm597_vm5, %v1566_v4, %v1562_v1  ;;  %v856_v32 = vsel %vm598_vm6, %v1566_v4, %v1562_v1  ;;  %vm599_vm7 = vcmp.gt.f32.partialorder %v343_v21, 0.0  ;;  %vm600_vm8 = vcmp.gt.f32.partialorder %v344_v25, 0.0  ;;  %v358_v51 = vld [vmem:[%s1555_s7 + $0x6b0] sm:$0xff]  ;;  %v359_v53 = vld [vmem:[%s1555_s7 + $0x6b8] sm:$0xff] }
  0xa2   : > { %1104 = vst [vmem:[%s1580_s22 + $0x5f0] sm:$0xff] %v848_v16  ;;  %1105 = vst [vmem:[%s1580_s22 + $0x5f8] sm:$0xff] %v849_v20  ;;  %v857_v36 = vsel %vm599_vm7, %v1566_v4, %v1562_v1  ;;  %vm601_vm9 = vcmp.gt.f32.partialorder %v345_v26, 0.0  ;;  %vm602_vm10 = vcmp.gt.f32.partialorder %v346_v27, 0.0  ;;  %v858_v38 = vsel %vm600_vm8, %v1566_v4, %v1562_v1  ;;  %v360_v57 = vld [vmem:[%s1555_s7 + $0x6c0] sm:$0xff]  ;;  %v361_v58 = vld [vmem:[%s1555_s7 + $0x6c8] sm:$0xff] }
  0xa3   : > { %1106 = vst [vmem:[%s1580_s22 + $0x600] sm:$0xff] %v850_v22  ;;  %1107 = vst [vmem:[%s1580_s22 + $0x608] sm:$0xff] %v851_v23  ;;  %v859_v39 = vsel %vm601_vm9, %v1566_v4, %v1562_v1  ;;  %v860_v40 = vsel %vm602_vm10, %v1566_v4, %v1562_v1  ;;  %vm603_vm11 = vcmp.gt.f32.partialorder %v347_v29, 0.0  ;;  %vm604_vm12 = vcmp.gt.f32.partialorder %v348_v33, 0.0  ;;  %v362_v59 = vld [vmem:[%s1555_s7 + $0x6d0] sm:$0xff]  ;;  %v363_v61 = vld [vmem:[%s1555_s7 + $0x6d8] sm:$0xff] }
  0xa4   : > { %1108 = vst [vmem:[%s1580_s22 + $0x610] sm:$0xff] %v852_v24  ;;  %1109 = vst [vmem:[%s1580_s22 + $0x618] sm:$0xff] %v853_v28  ;;  %v861_v44 = vsel %vm603_vm11, %v1566_v4, %v1562_v1  ;;  %vm605_vm13 = vcmp.gt.f32.partialorder %v349_v34, 0.0  ;;  %vm606_vm14 = vcmp.gt.f32.partialorder %v350_v35, 0.0  ;;  %v862_v46 = vsel %vm604_vm12, %v1566_v4, %v1562_v1  ;;  %v364_v2 = vld [vmem:[%s1555_s7 + $0x6e0] sm:$0xff]  ;;  %v365_v3 = vld [vmem:[%s1555_s7 + $0x6e8] sm:$0xff] }
  0xa5   : > { %1110 = vst [vmem:[%s1580_s22 + $0x620] sm:$0xff] %v854_v30  ;;  %1111 = vst [vmem:[%s1580_s22 + $0x628] sm:$0xff] %v855_v31  ;;  %v863_v47 = vsel %vm605_vm13, %v1566_v4, %v1562_v1  ;;  %v864_v48 = vsel %vm606_vm14, %v1566_v4, %v1562_v1  ;;  %vm607_vm15 = vcmp.gt.f32.partialorder %v351_v37, 0.0  ;;  %vm608_vm0 = vcmp.gt.f32.partialorder %v352_v41, 0.0  ;;  %v366_v5 = vld [vmem:[%s1555_s7 + $0x6f0] sm:$0xff]  ;;  %v367_v7 = vld [vmem:[%s1555_s7 + $0x6f8] sm:$0xff] }
  0xa6   : > { %1112 = vst [vmem:[%s1580_s22 + $0x630] sm:$0xff] %v856_v32  ;;  %1113 = vst [vmem:[%s1580_s22 + $0x638] sm:$0xff] %v857_v36  ;;  %v865_v52 = vsel %vm607_vm15, %v1566_v4, %v1562_v1  ;;  %vm609_vm1 = vcmp.gt.f32.partialorder %v353_v42, 0.0  ;;  %vm610_vm2 = vcmp.gt.f32.partialorder %v354_v43, 0.0  ;;  %v866_v54 = vsel %vm608_vm0, %v1566_v4, %v1562_v1  ;;  %v368_v11 = vld [vmem:[%s1555_s7 + $0x700] sm:$0xff]  ;;  %v369_v12 = vld [vmem:[%s1555_s7 + $0x708] sm:$0xff] }
  0xa7   : > { %1114 = vst [vmem:[%s1580_s22 + $0x640] sm:$0xff] %v858_v38  ;;  %1115 = vst [vmem:[%s1580_s22 + $0x648] sm:$0xff] %v859_v39  ;;  %v867_v55 = vsel %vm609_vm1, %v1566_v4, %v1562_v1  ;;  %v868_v56 = vsel %vm610_vm2, %v1566_v4, %v1562_v1  ;;  %vm611_vm3 = vcmp.gt.f32.partialorder %v355_v45, 0.0  ;;  %vm612_vm4 = vcmp.gt.f32.partialorder %v356_v49, 0.0  ;;  %v370_v13 = vld [vmem:[%s1555_s7 + $0x710] sm:$0xff]  ;;  %v371_v15 = vld [vmem:[%s1555_s7 + $0x718] sm:$0xff] }
  0xa8   : > { %1116 = vst [vmem:[%s1580_s22 + $0x650] sm:$0xff] %v860_v40  ;;  %1117 = vst [vmem:[%s1580_s22 + $0x658] sm:$0xff] %v861_v44  ;;  %v869_v60 = vsel %vm611_vm3, %v1566_v4, %v1562_v1  ;;  %vm613_vm5 = vcmp.gt.f32.partialorder %v357_v50, 0.0  ;;  %vm614_vm6 = vcmp.gt.f32.partialorder %v358_v51, 0.0  ;;  %v870_v62 = vsel %vm612_vm4, %v1566_v4, %v1562_v1  ;;  %v372_v19 = vld [vmem:[%s1555_s7 + $0x720] sm:$0xff]  ;;  %v373_v20 = vld [vmem:[%s1555_s7 + $0x728] sm:$0xff] }
  0xa9   : > { %1118 = vst [vmem:[%s1580_s22 + $0x660] sm:$0xff] %v862_v46  ;;  %1119 = vst [vmem:[%s1580_s22 + $0x668] sm:$0xff] %v863_v47  ;;  %v871_v63 = vsel %vm613_vm5, %v1566_v4, %v1562_v1  ;;  %v872_v0 = vsel %vm614_vm6, %v1566_v4, %v1562_v1  ;;  %vm615_vm7 = vcmp.gt.f32.partialorder %v359_v53, 0.0  ;;  %vm616_vm8 = vcmp.gt.f32.partialorder %v360_v57, 0.0  ;;  %v374_v21 = vld [vmem:[%s1555_s7 + $0x730] sm:$0xff]  ;;  %v375_v23 = vld [vmem:[%s1555_s7 + $0x738] sm:$0xff] }
  0xaa   : > { %1120 = vst [vmem:[%s1580_s22 + $0x670] sm:$0xff] %v864_v48  ;;  %1121 = vst [vmem:[%s1580_s22 + $0x678] sm:$0xff] %v865_v52  ;;  %v873_v6 = vsel %vm615_vm7, %v1566_v4, %v1562_v1  ;;  %vm617_vm9 = vcmp.gt.f32.partialorder %v361_v58, 0.0  ;;  %vm618_vm10 = vcmp.gt.f32.partialorder %v362_v59, 0.0  ;;  %v874_v8 = vsel %vm616_vm8, %v1566_v4, %v1562_v1  ;;  %v376_v27 = vld [vmem:[%s1555_s7 + $0x740] sm:$0xff]  ;;  %v377_v28 = vld [vmem:[%s1555_s7 + $0x748] sm:$0xff] }
  0xab   : > { %1122 = vst [vmem:[%s1580_s22 + $0x680] sm:$0xff] %v866_v54  ;;  %1123 = vst [vmem:[%s1580_s22 + $0x688] sm:$0xff] %v867_v55  ;;  %v875_v9 = vsel %vm617_vm9, %v1566_v4, %v1562_v1  ;;  %v876_v10 = vsel %vm618_vm10, %v1566_v4, %v1562_v1  ;;  %vm619_vm11 = vcmp.gt.f32.partialorder %v363_v61, 0.0  ;;  %vm620_vm12 = vcmp.gt.f32.partialorder %v364_v2, 0.0  ;;  %v378_v29 = vld [vmem:[%s1555_s7 + $0x750] sm:$0xff]  ;;  %v379_v31 = vld [vmem:[%s1555_s7 + $0x758] sm:$0xff] }
  0xac   : > { %1124 = vst [vmem:[%s1580_s22 + $0x690] sm:$0xff] %v868_v56  ;;  %1125 = vst [vmem:[%s1580_s22 + $0x698] sm:$0xff] %v869_v60  ;;  %v877_v14 = vsel %vm619_vm11, %v1566_v4, %v1562_v1  ;;  %vm621_vm13 = vcmp.gt.f32.partialorder %v365_v3, 0.0  ;;  %vm622_vm14 = vcmp.gt.f32.partialorder %v366_v5, 0.0  ;;  %v878_v16 = vsel %vm620_vm12, %v1566_v4, %v1562_v1  ;;  %v380_v35 = vld [vmem:[%s1555_s7 + $0x760] sm:$0xff]  ;;  %v381_v36 = vld [vmem:[%s1555_s7 + $0x768] sm:$0xff] }
  0xad   : > { %1126 = vst [vmem:[%s1580_s22 + $0x6a0] sm:$0xff] %v870_v62  ;;  %1127 = vst [vmem:[%s1580_s22 + $0x6a8] sm:$0xff] %v871_v63  ;;  %v879_v17 = vsel %vm621_vm13, %v1566_v4, %v1562_v1  ;;  %v880_v18 = vsel %vm622_vm14, %v1566_v4, %v1562_v1  ;;  %vm623_vm15 = vcmp.gt.f32.partialorder %v367_v7, 0.0  ;;  %vm624_vm0 = vcmp.gt.f32.partialorder %v368_v11, 0.0  ;;  %v382_v37 = vld [vmem:[%s1555_s7 + $0x770] sm:$0xff]  ;;  %v383_v39 = vld [vmem:[%s1555_s7 + $0x778] sm:$0xff] }
  0xae   : > { %1128 = vst [vmem:[%s1580_s22 + $0x6b0] sm:$0xff] %v872_v0  ;;  %1129 = vst [vmem:[%s1580_s22 + $0x6b8] sm:$0xff] %v873_v6  ;;  %v881_v22 = vsel %vm623_vm15, %v1566_v4, %v1562_v1  ;;  %vm625_vm1 = vcmp.gt.f32.partialorder %v369_v12, 0.0  ;;  %vm626_vm2 = vcmp.gt.f32.partialorder %v370_v13, 0.0  ;;  %v882_v24 = vsel %vm624_vm0, %v1566_v4, %v1562_v1  ;;  %v384_v43 = vld [vmem:[%s1555_s7 + $0x780] sm:$0xff]  ;;  %v385_v44 = vld [vmem:[%s1555_s7 + $0x788] sm:$0xff] }
  0xaf   : > { %1130 = vst [vmem:[%s1580_s22 + $0x6c0] sm:$0xff] %v874_v8  ;;  %1131 = vst [vmem:[%s1580_s22 + $0x6c8] sm:$0xff] %v875_v9  ;;  %v883_v25 = vsel %vm625_vm1, %v1566_v4, %v1562_v1  ;;  %v884_v26 = vsel %vm626_vm2, %v1566_v4, %v1562_v1  ;;  %vm627_vm3 = vcmp.gt.f32.partialorder %v371_v15, 0.0  ;;  %vm628_vm4 = vcmp.gt.f32.partialorder %v372_v19, 0.0  ;;  %v386_v45 = vld [vmem:[%s1555_s7 + $0x790] sm:$0xff]  ;;  %v387_v47 = vld [vmem:[%s1555_s7 + $0x798] sm:$0xff] }
  0xb0   : > { %1132 = vst [vmem:[%s1580_s22 + $0x6d0] sm:$0xff] %v876_v10  ;;  %1133 = vst [vmem:[%s1580_s22 + $0x6d8] sm:$0xff] %v877_v14  ;;  %v885_v30 = vsel %vm627_vm3, %v1566_v4, %v1562_v1  ;;  %vm629_vm5 = vcmp.gt.f32.partialorder %v373_v20, 0.0  ;;  %vm630_vm6 = vcmp.gt.f32.partialorder %v374_v21, 0.0  ;;  %v886_v32 = vsel %vm628_vm4, %v1566_v4, %v1562_v1  ;;  %v388_v51 = vld [vmem:[%s1555_s7 + $0x7a0] sm:$0xff]  ;;  %v389_v52 = vld [vmem:[%s1555_s7 + $0x7a8] sm:$0xff] }
  0xb1   : > { %1134 = vst [vmem:[%s1580_s22 + $0x6e0] sm:$0xff] %v878_v16  ;;  %1135 = vst [vmem:[%s1580_s22 + $0x6e8] sm:$0xff] %v879_v17  ;;  %v887_v33 = vsel %vm629_vm5, %v1566_v4, %v1562_v1  ;;  %v888_v34 = vsel %vm630_vm6, %v1566_v4, %v1562_v1  ;;  %vm631_vm7 = vcmp.gt.f32.partialorder %v375_v23, 0.0  ;;  %vm632_vm8 = vcmp.gt.f32.partialorder %v376_v27, 0.0  ;;  %v390_v53 = vld [vmem:[%s1555_s7 + $0x7b0] sm:$0xff]  ;;  %v391_v55 = vld [vmem:[%s1555_s7 + $0x7b8] sm:$0xff] }
  0xb2   : > { %1136 = vst [vmem:[%s1580_s22 + $0x6f0] sm:$0xff] %v880_v18  ;;  %1137 = vst [vmem:[%s1580_s22 + $0x6f8] sm:$0xff] %v881_v22  ;;  %v889_v38 = vsel %vm631_vm7, %v1566_v4, %v1562_v1  ;;  %vm633_vm9 = vcmp.gt.f32.partialorder %v377_v28, 0.0  ;;  %vm634_vm10 = vcmp.gt.f32.partialorder %v378_v29, 0.0  ;;  %v890_v40 = vsel %vm632_vm8, %v1566_v4, %v1562_v1  ;;  %v392_v59 = vld [vmem:[%s1555_s7 + $0x7c0] sm:$0xff]  ;;  %v393_v60 = vld [vmem:[%s1555_s7 + $0x7c8] sm:$0xff] }
  0xb3   : > { %1138 = vst [vmem:[%s1580_s22 + $0x700] sm:$0xff] %v882_v24  ;;  %1139 = vst [vmem:[%s1580_s22 + $0x708] sm:$0xff] %v883_v25  ;;  %v891_v41 = vsel %vm633_vm9, %v1566_v4, %v1562_v1  ;;  %v892_v42 = vsel %vm634_vm10, %v1566_v4, %v1562_v1  ;;  %vm635_vm11 = vcmp.gt.f32.partialorder %v379_v31, 0.0  ;;  %vm636_vm12 = vcmp.gt.f32.partialorder %v380_v35, 0.0  ;;  %v394_v61 = vld [vmem:[%s1555_s7 + $0x7d0] sm:$0xff]  ;;  %v395_v63 = vld [vmem:[%s1555_s7 + $0x7d8] sm:$0xff] }
  0xb4   : > { %1140 = vst [vmem:[%s1580_s22 + $0x710] sm:$0xff] %v884_v26  ;;  %1141 = vst [vmem:[%s1580_s22 + $0x718] sm:$0xff] %v885_v30  ;;  %v893_v46 = vsel %vm635_vm11, %v1566_v4, %v1562_v1  ;;  %vm637_vm13 = vcmp.gt.f32.partialorder %v381_v36, 0.0  ;;  %vm638_vm14 = vcmp.gt.f32.partialorder %v382_v37, 0.0  ;;  %v894_v48 = vsel %vm636_vm12, %v1566_v4, %v1562_v1  ;;  %v396_v5 = vld [vmem:[%s1555_s7 + $0x7e0] sm:$0xff]  ;;  %v397_v6 = vld [vmem:[%s1555_s7 + $0x7e8] sm:$0xff] }
  0xb5   : > { %1142 = vst [vmem:[%s1580_s22 + $0x720] sm:$0xff] %v886_v32  ;;  %1143 = vst [vmem:[%s1580_s22 + $0x728] sm:$0xff] %v887_v33  ;;  %v895_v49 = vsel %vm637_vm13, %v1566_v4, %v1562_v1  ;;  %v896_v50 = vsel %vm638_vm14, %v1566_v4, %v1562_v1  ;;  %vm639_vm15 = vcmp.gt.f32.partialorder %v383_v39, 0.0  ;;  %vm640_vm0 = vcmp.gt.f32.partialorder %v384_v43, 0.0  ;;  %v398_v7 = vld [vmem:[%s1555_s7 + $0x7f0] sm:$0xff]  ;;  %v399_v9 = vld [vmem:[%s1555_s7 + $0x7f8] sm:$0xff] }
  0xb6   : > { %1144 = vst [vmem:[%s1580_s22 + $0x730] sm:$0xff] %v888_v34  ;;  %1145 = vst [vmem:[%s1580_s22 + $0x738] sm:$0xff] %v889_v38  ;;  %v897_v54 = vsel %vm639_vm15, %v1566_v4, %v1562_v1  ;;  %vm641_vm1 = vcmp.gt.f32.partialorder %v385_v44, 0.0  ;;  %vm642_vm2 = vcmp.gt.f32.partialorder %v386_v45, 0.0  ;;  %v898_v56 = vsel %vm640_vm0, %v1566_v4, %v1562_v1 }
  0xb7   : > { %1146 = vst [vmem:[%s1580_s22 + $0x740] sm:$0xff] %v890_v40  ;;  %1147 = vst [vmem:[%s1580_s22 + $0x748] sm:$0xff] %v891_v41  ;;  %v899_v57 = vsel %vm641_vm1, %v1566_v4, %v1562_v1  ;;  %v900_v58 = vsel %vm642_vm2, %v1566_v4, %v1562_v1  ;;  %vm643_vm3 = vcmp.gt.f32.partialorder %v387_v47, 0.0  ;;  %vm644_vm4 = vcmp.gt.f32.partialorder %v388_v51, 0.0 }
  0xb8   : > { %1148 = vst [vmem:[%s1580_s22 + $0x750] sm:$0xff] %v892_v42  ;;  %1149 = vst [vmem:[%s1580_s22 + $0x758] sm:$0xff] %v893_v46  ;;  %v901_v62 = vsel %vm643_vm3, %v1566_v4, %v1562_v1  ;;  %vm645_vm5 = vcmp.gt.f32.partialorder %v389_v52, 0.0  ;;  %vm646_vm6 = vcmp.gt.f32.partialorder %v390_v53, 0.0  ;;  %v902_v0 = vsel %vm644_vm4, %v1566_v4, %v1562_v1 }
  0xb9   : > { %1150 = vst [vmem:[%s1580_s22 + $0x760] sm:$0xff] %v894_v48  ;;  %1151 = vst [vmem:[%s1580_s22 + $0x768] sm:$0xff] %v895_v49  ;;  %v903_v2 = vsel %vm645_vm5, %v1566_v4, %v1562_v1  ;;  %v904_v3 = vsel %vm646_vm6, %v1566_v4, %v1562_v1  ;;  %vm647_vm7 = vcmp.gt.f32.partialorder %v391_v55, 0.0  ;;  %vm648_vm8 = vcmp.gt.f32.partialorder %v392_v59, 0.0 }
  0xba   : > { %1152 = vst [vmem:[%s1580_s22 + $0x770] sm:$0xff] %v896_v50  ;;  %1153 = vst [vmem:[%s1580_s22 + $0x778] sm:$0xff] %v897_v54  ;;  %v905_v8 = vsel %vm647_vm7, %v1566_v4, %v1562_v1  ;;  %vm649_vm9 = vcmp.gt.f32.partialorder %v393_v60, 0.0  ;;  %vm650_vm10 = vcmp.gt.f32.partialorder %v394_v61, 0.0  ;;  %v906_v10 = vsel %vm648_vm8, %v1566_v4, %v1562_v1 }
  0xbb   : > { %1154 = vst [vmem:[%s1580_s22 + $0x780] sm:$0xff] %v898_v56  ;;  %1155 = vst [vmem:[%s1580_s22 + $0x788] sm:$0xff] %v899_v57  ;;  %v907_v11 = vsel %vm649_vm9, %v1566_v4, %v1562_v1  ;;  %v908_v12 = vsel %vm650_vm10, %v1566_v4, %v1562_v1  ;;  %vm651_vm11 = vcmp.gt.f32.partialorder %v395_v63, 0.0  ;;  %vm652_vm12 = vcmp.gt.f32.partialorder %v396_v5, 0.0 }
  0xbc   : > { %1156 = vst [vmem:[%s1580_s22 + $0x790] sm:$0xff] %v900_v58  ;;  %1157 = vst [vmem:[%s1580_s22 + $0x798] sm:$0xff] %v901_v62  ;;  %v909_v13 = vsel %vm651_vm11, %v1566_v4, %v1562_v1  ;;  %vm653_vm13 = vcmp.gt.f32.partialorder %v397_v6, 0.0  ;;  %vm654_vm14 = vcmp.gt.f32.partialorder %v398_v7, 0.0  ;;  %v910_v14 = vsel %vm652_vm12, %v1566_v4, %v1562_v1 }
  0xbd   : > { %1158 = vst [vmem:[%s1580_s22 + $0x7a0] sm:$0xff] %v902_v0  ;;  %1159 = vst [vmem:[%s1580_s22 + $0x7a8] sm:$0xff] %v903_v2  ;;  %v911_v15 = vsel %vm653_vm13, %v1566_v4, %v1562_v1  ;;  %v912_v16 = vsel %vm654_vm14, %v1566_v4, %v1562_v1  ;;  %vm655_vm15 = vcmp.gt.f32.partialorder %v399_v9, 0.0 }
  0xbe   : > { %1160 = vst [vmem:[%s1580_s22 + $0x7b0] sm:$0xff] %v904_v3  ;;  %1161 = vst [vmem:[%s1580_s22 + $0x7b8] sm:$0xff] %v905_v8  ;;  %v913_v17 = vsel %vm655_vm15, %v1566_v4, %v1562_v1 }
  0xbf   : > { %1162 = vst [vmem:[%s1580_s22 + $0x7c0] sm:$0xff] %v906_v10  ;;  %1163 = vst [vmem:[%s1580_s22 + $0x7c8] sm:$0xff] %v907_v11 }
  0xc0   : > { %1164 = vst [vmem:[%s1580_s22 + $0x7d0] sm:$0xff] %v908_v12  ;;  %1165 = vst [vmem:[%s1580_s22 + $0x7d8] sm:$0xff] %v909_v13 }
  0xc1   : > { %1166 = vst [vmem:[%s1580_s22 + $0x7e0] sm:$0xff] %v910_v14  ;;  %1167 = vst [vmem:[%s1580_s22 + $0x7e8] sm:$0xff] %v911_v15 }
  0xc2   : > { %1168 = vst [vmem:[%s1580_s22 + $0x7f0] sm:$0xff] %v912_v16  ;;  %1169 = vst [vmem:[%s1580_s22 + $0x7f8] sm:$0xff] %v913_v17 }
  0xc3   : > { %1374 = shalt.err (!%p1371_p10)
}
  0xc4   : > { %s1375_s21 = scalar_lea.hbm %s2583_s9, 32768  ;;  %s1379_s27 = scalar_lea.hbm %s2643_s2, 65536 }
  0xc5   : > { %p1376_p0 = scmp.ne.s32.totalorder %s2583_s9, %s1375_s21  ;;  %p1380_p1 = scmp.lt.s32.totalorder %s2583_s9, %s2643_s2 }
  0xc6   : > { %p1381_p3 = scmp.lt.s32.totalorder %s1379_s27, %s1375_s21 }
  0xc7   : > { %p1377_p2 = pnand %p1376_p0, %p2652_p12 }
  0xc8   : > { %p1382_p6 = por %p1381_p3, %p1380_p1 }
  0xc9   : > { %p1378_p9 = pneg %p1377_p2 }
  0xcb   : > { %p1383_p11 = pnand %p1382_p6, %p1378_p9 }
  0xcd   : > { %1386 = shalt.err (!%p1383_p11)
}
  0xce   : > { %s1434_s7 = smov 128   ;;  %s1435_s30 = smov 8  }
  0xcf   : > { %1276 = dma.vmem_to_hbm [thread:$0]  (%p2652_p12), %s2592_s6, 32768, %s2583_s9, %s1171_s10, %s1434_s7, %s1434_s7, %s1435_s30  }
  0xd0 PF: > { %s1199_s4 = sand.u32 1, %s1415_s12   ;;  %p2653_p13 = scmp.ne.s32.totalorder %s2649_s24, 0 }
  0xd1   : > { %p2654_p4 = scmp.ge.s32.totalorder %s1427_s15, 2  ;;  %s1200_s22 = scalar_lea.sflag [#allocation6], %s1199_s4 }
  0xd3   : > { %p1283_p5 = pnand %p2654_p4, %p2653_p13 }
  0xd5   : > { %p1284_p7 = pneg %p1283_p5 }
  0xd7   : > { %1410 = dma.done.wait (%p1284_p7), %s1200_s22, 32768  }
  0xd8   : > { %1412 = vsyncadd (%p1284_p7), %s1200_s22, 4294934528  ;;  %p19_p8 = scmp.ge.s32.totalorder %s1479_s17, 4   ;;  %s2655_s12 = smov %s1419_s13 }
  0xd9   : > { %s2656_s13 = smov %s1423_s14  ;;  %s2657_s14 = smov %s1491_s20 }
  0xda   : > { %s2658_s15 = smov %s1479_s17  ;;  %21 = sbr.rel (!%p19_p8) target bundleno = 10 (0xa), region = 69 }
  0xdf   :  { %1205 = vsyncpa [#allocation5], 1 }
  0xe0   :  { %1207 = vsyncpa [#allocation5 + $0x1], 1 }
  0xe1   :  { %1208 = vsyncpa [#allocation6], 1 }
  0xe2   :  { %1210 = vsyncpa [#allocation6 + $0x1], 1 }

</bundles_post_ra>
